<compile_context>
chip_gen: v6e
topology: v6e:2x2x1
jax: 0.10.0
libtpu: 0.0.40
codegen_flags: <defaults>
</compile_context>

<pallas_src>
import functools

import jax
import jax.numpy as jnp
from jax.experimental import pallas as pl
from jax.experimental.pallas import tpu as pltpu


def _cnn_encoder_kernel(x_ref, w_ref, b_ref, o_ref, *, kernel_size, seq_len):
    """Fused num_layers x (conv1d + residual + tanh) on one block of rows.

    x_ref: (R, H)                 R = (#whole sequences in block) * seq_len, channels-last
    w_ref: (num_layers, K*H, H)   im2col-packed weights (taps along contraction dim)
    b_ref: (num_layers, 1, H)     biases (float32)
    o_ref: (R, H)
    """
    R, H = x_ref.shape
    num_layers = w_ref.shape[0]
    mdtype = w_ref.dtype
    pad = (kernel_size - 1) // 2

    # Hoisted per-tap boundary masks as (R, 1) 0/1 f32 multipliers.  pltpu.roll
    # wraps rows across sequence boundaries; the mask re-creates Conv1d's zero
    # padding (valid only because each block contains WHOLE sequences).
    pos = jax.lax.broadcasted_iota(jnp.int32, (R, 1), 0) % seq_len
    tap_shift = [pad - k for k in range(kernel_size)]
    tap_mask = []
    for s in tap_shift:
        if s > 0:        # tap reads row (r - s): invalid for first s rows of a sequence
            tap_mask.append((pos >= s).astype(jnp.float32))
        elif s < 0:      # tap reads row (r + |s|): invalid for last |s| rows
            tap_mask.append((pos < seq_len + s).astype(jnp.float32))
        else:
            tap_mask.append(None)

    x = x_ref[...].astype(jnp.float32)
    for layer in range(num_layers):          # static unroll; activation stays on-chip
        # Build im2col LHS: taps concatenated along the contraction (lane) dim.
        parts = []
        for k in range(kernel_size):
            s = tap_shift[k]
            if s == 0:
                parts.append(x.astype(mdtype))
            else:
                # XLU sublane rotate (shift kept non-negative via modulo).
                rolled = pltpu.roll(x, s % R, axis=0)
                parts.append((rolled * tap_mask[k]).astype(mdtype))
        lhs = jnp.concatenate(parts, axis=1)                          # (R, K*H)
        # One MXU matmul per layer; the K-tap sum happens inside the contraction.
        z = jnp.dot(lhs, w_ref[layer], preferred_element_type=jnp.float32)   # (R, H)
        x = jnp.tanh(z + b_ref[layer] + x)    # f32 epilogue (v5e has no bf16 VPU/EUP)
    o_ref[...] = x.astype(o_ref.dtype)


def _rows_per_block(batch, seq_len, target_rows):
    """Rows per grid step.

    Blocks always contain whole sequences (required by the boundary masks) and,
    unless we fall back to the single full-array block, are a multiple of 8
    sublanes.  Preference order: (1) >=2 grid steps so v7x's second TensorCore
    gets work and the pipeline actually pipelines, (2) an even number of steps,
    (3) block size close to target_rows.
    """
    M = batch * seq_len
    best, best_key = M, (2, 1, 0)            # sentinel; any candidate beats it
    for spb in range(1, batch + 1):          # sequences per block
        if batch % spb:
            continue
        rows, nblk = spb * seq_len, batch // spb
        if nblk > 1 and rows % 8:            # (8,128) sublane rule for partial blocks
            continue
        key = (0 if nblk > 1 else 1,
               0 if (nblk > 1 and nblk % 2 == 0) else 1,
               abs(rows - target_rows))
        if key < best_key:
            best, best_key = rows, key
    return best


def init_params(key, hid_dim, kernel_size, num_layers):
    """PyTorch-layout Conv1d params: per layer weight (H_out, H_in, K), bias (H_out,)."""
    params = []
    bound = 1.0 / (hid_dim * kernel_size) ** 0.5
    for i in range(num_layers):
        kw, kb = jax.random.split(jax.random.fold_in(key, i))
        w = jax.random.uniform(
            kw, (hid_dim, hid_dim, kernel_size), jnp.float32, -bound, bound)
        b = jax.random.uniform(kb, (hid_dim,), jnp.float32, -bound, bound)
        params.append((w, b))
    return params


def prepare_params(params, matmul_dtype=jnp.bfloat16):
    """One-time packing of PyTorch-layout params for the fused kernel.

    Returns:
      w_all: (num_layers, K*H, H) with w_all[l, k*H + i, o] = w_l[o, i, k]
             (im2col layout: taps along the CONTRACTION dim), cast to
             `matmul_dtype` (bf16 default: all TPU MXUs are bf16-native; pass
             jnp.float32 for exact f32 matmuls).
      b_all: (num_layers, 1, H) float32 (epilogue stays f32 on all generations).
    """
    w_list, b_list = [], []
    for (w, b) in params:
        h_out, h_in, k = w.shape
        w_cat = jnp.transpose(w, (2, 1, 0)).reshape(k * h_in, h_out)
        w_list.append(w_cat.astype(matmul_dtype))
        b_list.append(b.astype(jnp.float32).reshape(1, h_out))
    return jnp.stack(w_list, axis=0), jnp.stack(b_list, axis=0)


def cnn_encoder_forward(src, w_all, b_all, *, kernel_size=3,
                        block_target_rows=2048,
                        vmem_budget_bytes=40 * 1024 * 1024):
    """src: (B, L, H) float32 -> (B, L, H). Matches the PyTorch module in eval mode
    (the module's internal (B,H,L) transposes cancel against the channels-last layout)."""
    # TODO(synk): training-mode dropout (nn.Dropout(0.2)) not implemented; eval identity.
    assert kernel_size % 2 == 1, (
        "only odd kernel_size preserves length with PyTorch padding=kernel_size//2")
    B, L, H = src.shape
    num_layers = w_all.shape[0]
    assert w_all.shape == (num_layers, kernel_size * H, H)
    assert b_all.shape == (num_layers, 1, H)

    M = B * L
    src_isz = src.dtype.itemsize
    mm_isz = w_all.dtype.itemsize
    w_bytes = w_all.size * mm_isz
    b_bytes = b_all.size * b_all.dtype.itemsize

    # Per-row VMEM estimate: double-buffered in+out blocks, f32 activation,
    # im2col LHS, f32 matmul result.
    per_row = 2 * 2 * H * src_isz + H * 4 + kernel_size * H * mm_isz + H * 4
    target = min(block_target_rows,
                 max(L, (vmem_budget_bytes - 2 * (w_bytes + b_bytes)) // per_row))
    rows_blk = _rows_per_block(B, L, target)
    grid = (M // rows_blk,)

    vmem_limit = int(2 * (w_bytes + b_bytes) + rows_blk * per_row) + (8 << 20)
    vmem_limit = min(vmem_limit, 100 * 1024 * 1024)

    cost = pl.CostEstimate(
        flops=2 * M * (kernel_size * H) * H * num_layers,
        transcendentals=M * H * num_layers,
        bytes_accessed=2 * M * H * src_isz + w_bytes + b_bytes,
    )

    kernel = functools.partial(_cnn_encoder_kernel, kernel_size=kernel_size, seq_len=L)
    out2d = pl.pallas_call(
        kernel,
        out_shape=jax.ShapeDtypeStruct((M, H), src.dtype),
        grid_spec=pltpu.PrefetchScalarGridSpec(
            num_scalar_prefetch=0,
            grid=grid,
            in_specs=[
                pl.BlockSpec((rows_blk, H), lambda i: (i, 0)),
                # Constant block index => weights/bias DMA'd once, reused every step.
                pl.BlockSpec((num_layers, kernel_size * H, H), lambda i: (0, 0, 0)),
                pl.BlockSpec((num_layers, 1, H), lambda i: (0, 0, 0)),
            ],
            out_specs=pl.BlockSpec((rows_blk, H), lambda i: (i, 0)),
        ),
        compiler_params=pltpu.CompilerParams(
            dimension_semantics=("parallel",),   # row blocks shard across TCs (v7x)
            vmem_limit_bytes=vmem_limit,
        ),
        cost_estimate=cost,
    )(src.reshape(M, H), w_all, b_all)
    return out2d.reshape(B, L, H)


if __name__ == "__main__":
    B, L, H = 2, 8, 128            # small demo shapes; H = hid_dim (lane axis)
    kernel_size, num_layers = 3, 5

    key = jax.random.PRNGKey(0)
    k_in, k_par = jax.random.split(key)
    src = jax.random.normal(k_in, (B, L, H), dtype=jnp.float32)
    params = init_params(k_par, H, kernel_size, num_layers)

    # Pure-JAX reference of the same math (PyTorch Conv1d semantics, f32).
    def ref_forward(x, params):
        for (w, b) in params:
            xc = jnp.transpose(x, (0, 2, 1))                       # (B, H, L)
            y = jax.lax.conv_general_dilated(
                xc, w, window_strides=(1,),
                padding=((kernel_size // 2, kernel_size // 2),),
                dimension_numbers=("NCW", "OIW", "NCW"),
            ) + b[None, :, None]
            x = jnp.transpose(jnp.tanh(y + xc), (0, 2, 1))
        return x

    ref = ref_forward(src, params)

    # Exact f32 matmul path.
    w32, b32 = prepare_params(params, matmul_dtype=jnp.float32)
    out32 = jax.block_until_ready(
        cnn_encoder_forward(src, w32, b32, kernel_size=kernel_size))
    assert out32.shape == (B, L, H)
    assert jnp.allclose(out32, ref, atol=1e-5, rtol=1e-5), "f32 mismatch vs reference"

    # Default bf16 matmul path (f32 accumulation + f32 epilogue).
    w_bf, b_bf = prepare_params(params)
    out_bf = jax.block_until_ready(
        cnn_encoder_forward(src, w_bf, b_bf, kernel_size=kernel_size))
    assert jnp.allclose(out_bf, ref, atol=1e-1, rtol=0.0), "bf16 mismatch vs reference"

    print("KERNEL_OK")
</pallas_src>

<mosaic_0001>
module attributes {stable_mosaic.version = 11 : i64} {
  func.func @_cnn_encoder_kernel(%arg0: i32, %arg1: memref<8x128xf32, #tpu.memory_space<vmem>>, %arg2: memref<5x384x128xf32, #tpu.memory_space<vmem>>, %arg3: memref<5x1x128xf32, #tpu.memory_space<vmem>>, %arg4: memref<8x128xf32, #tpu.memory_space<vmem>>) attributes {dimension_semantics = [#tpu.dimension_semantics<parallel>], iteration_bounds = array<i64: 2>, scalar_prefetch = 0 : i64, scratch_operands = 0 : i64, tpu.core_type = #tpu.core_type<tc>, window_params = [{transform_indices = @transform_0, window_bounds = array<i64: 8, 128>}, {pipeline_mode = #tpu.pipeline_mode<synchronous>, transform_indices = @transform_1, window_bounds = array<i64: 5, 384, 128>}, {pipeline_mode = #tpu.pipeline_mode<synchronous>, transform_indices = @transform_2, window_bounds = array<i64: 5, 1, 128>}, {transform_indices = @transform_3, window_bounds = array<i64: 8, 128>}]} {
    %0 = tpu.iota {dimensions = array<i32: 0>} : vector<8x1xi32>
    %c8_i32 = arith.constant 8 : i32
    %c0_i32 = arith.constant 0 : i32
    %1 = arith.cmpi eq, %c8_i32, %c0_i32 : i32
    %c1_i32 = arith.constant 1 : i32
    %2 = arith.select %1, %c1_i32, %c8_i32 : i32
    %3 = vector.broadcast %2 : i32 to vector<8x1xi32>
    %4 = arith.remsi %0, %3 : vector<8x1xi32>
    %c0_i32_0 = arith.constant 0 : i32
    %5 = vector.broadcast %c0_i32_0 : i32 to vector<8x1xi32>
    %6 = arith.cmpi ne, %4, %5 : vector<8x1xi32>
    %c0_i32_1 = arith.constant 0 : i32
    %7 = vector.broadcast %c0_i32_1 : i32 to vector<8x1xi32>
    %8 = arith.cmpi slt, %4, %7 : vector<8x1xi32>
    %c0_i32_2 = arith.constant 0 : i32
    %9 = arith.cmpi slt, %2, %c0_i32_2 : i32
    %10 = vector.broadcast %9 : i1 to vector<8x1xi1>
    %11 = vector.broadcast %10 : vector<8x1xi1> to vector<8x1xi1>
    %12 = arith.xori %8, %11 : vector<8x1xi1>
    %13 = arith.andi %12, %6 : vector<8x1xi1>
    %14 = vector.broadcast %2 : i32 to vector<8x1xi32>
    %15 = arith.addi %4, %14 : vector<8x1xi32>
    %16 = arith.select %13, %15, %4 : vector<8x1xi1>, vector<8x1xi32>
    %c1_i32_3 = arith.constant 1 : i32
    %17 = vector.broadcast %c1_i32_3 : i32 to vector<8x1xi32>
    %18 = arith.cmpi sge, %16, %17 : vector<8x1xi32>
    %19 = arith.extui %18 : vector<8x1xi1> to vector<8x1xi32>
    %20 = arith.sitofp %19 : vector<8x1xi32> to vector<8x1xf32>
    %c7_i32 = arith.constant 7 : i32
    %21 = vector.broadcast %c7_i32 : i32 to vector<8x1xi32>
    %22 = arith.cmpi slt, %16, %21 : vector<8x1xi32>
    %23 = arith.extui %22 : vector<8x1xi1> to vector<8x1xi32>
    %24 = arith.sitofp %23 : vector<8x1xi32> to vector<8x1xf32>
    %c0 = arith.constant 0 : index
    %c0_4 = arith.constant 0 : index
    %25 = vector.load %arg1[%c0, %c0_4] : memref<8x128xf32, #tpu.memory_space<vmem>>, vector<8x128xf32>
    %c1_i32_5 = arith.constant 1 : i32
    %26 = tpu.dynamic_rotate %25 by %c1_i32_5 dim 0 : vector<8x128xf32>, i32 -> vector<8x128xf32>
    %27 = vector.broadcast %20 : vector<8x1xf32> to vector<8x128xf32>
    %28 = arith.mulf %26, %27 : vector<8x128xf32>
    %c7_i32_6 = arith.constant 7 : i32
    %29 = tpu.dynamic_rotate %25 by %c7_i32_6 dim 0 : vector<8x128xf32>, i32 -> vector<8x128xf32>
    %30 = vector.broadcast %24 : vector<8x1xf32> to vector<8x128xf32>
    %31 = arith.mulf %29, %30 : vector<8x128xf32>
    %32 = tpu.concatenate %28, %25, %31 in 1 : vector<8x128xf32>, vector<8x128xf32>, vector<8x128xf32> -> vector<8x384xf32>
    %c0_7 = arith.constant 0 : index
    %c0_8 = arith.constant 0 : index
    %c0_9 = arith.constant 0 : index
    %33 = vector.load %arg2[%c0_7, %c0_8, %c0_9] : memref<5x384x128xf32, #tpu.memory_space<vmem>>, vector<1x384x128xf32>
    %34 = vector.shape_cast %33 : vector<1x384x128xf32> to vector<384x128xf32>
    %cst = arith.constant dense<0.000000e+00> : vector<8x128xf32>
    %35 = tpu.matmul %32, %34, %cst {dimension_numbers = #tpu.dot_dimension_numbers<[1], [0], [0], [1], [0, 0, 1, 1], [], []>} : vector<8x384xf32>, vector<384x128xf32>, vector<8x128xf32> -> vector<8x128xf32>
    %c0_10 = arith.constant 0 : index
    %c0_11 = arith.constant 0 : index
    %c0_12 = arith.constant 0 : index
    %36 = vector.load %arg3[%c0_10, %c0_11, %c0_12] : memref<5x1x128xf32, #tpu.memory_space<vmem>>, vector<1x1x128xf32>
    %37 = vector.shape_cast %36 : vector<1x1x128xf32> to vector<1x128xf32>
    %38 = vector.broadcast %37 : vector<1x128xf32> to vector<8x128xf32>
    %39 = arith.addf %35, %38 : vector<8x128xf32>
    %40 = arith.addf %39, %25 : vector<8x128xf32>
    %41 = math.tanh %40 : vector<8x128xf32>
    %c1_i32_13 = arith.constant 1 : i32
    %42 = tpu.dynamic_rotate %41 by %c1_i32_13 dim 0 : vector<8x128xf32>, i32 -> vector<8x128xf32>
    %43 = vector.broadcast %20 : vector<8x1xf32> to vector<8x128xf32>
    %44 = arith.mulf %42, %43 : vector<8x128xf32>
    %c7_i32_14 = arith.constant 7 : i32
    %45 = tpu.dynamic_rotate %41 by %c7_i32_14 dim 0 : vector<8x128xf32>, i32 -> vector<8x128xf32>
    %46 = vector.broadcast %24 : vector<8x1xf32> to vector<8x128xf32>
    %47 = arith.mulf %45, %46 : vector<8x128xf32>
    %48 = tpu.concatenate %44, %41, %47 in 1 : vector<8x128xf32>, vector<8x128xf32>, vector<8x128xf32> -> vector<8x384xf32>
    %c1 = arith.constant 1 : index
    %c0_15 = arith.constant 0 : index
    %c0_16 = arith.constant 0 : index
    %49 = vector.load %arg2[%c1, %c0_15, %c0_16] : memref<5x384x128xf32, #tpu.memory_space<vmem>>, vector<1x384x128xf32>
    %50 = vector.shape_cast %49 : vector<1x384x128xf32> to vector<384x128xf32>
    %cst_17 = arith.constant dense<0.000000e+00> : vector<8x128xf32>
    %51 = tpu.matmul %48, %50, %cst_17 {dimension_numbers = #tpu.dot_dimension_numbers<[1], [0], [0], [1], [0, 0, 1, 1], [], []>} : vector<8x384xf32>, vector<384x128xf32>, vector<8x128xf32> -> vector<8x128xf32>
    %c1_18 = arith.constant 1 : index
    %c0_19 = arith.constant 0 : index
    %c0_20 = arith.constant 0 : index
    %52 = vector.load %arg3[%c1_18, %c0_19, %c0_20] : memref<5x1x128xf32, #tpu.memory_space<vmem>>, vector<1x1x128xf32>
    %53 = vector.shape_cast %52 : vector<1x1x128xf32> to vector<1x128xf32>
    %54 = vector.broadcast %53 : vector<1x128xf32> to vector<8x128xf32>
    %55 = arith.addf %51, %54 : vector<8x128xf32>
    %56 = arith.addf %55, %41 : vector<8x128xf32>
    %57 = math.tanh %56 : vector<8x128xf32>
    %c1_i32_21 = arith.constant 1 : i32
    %58 = tpu.dynamic_rotate %57 by %c1_i32_21 dim 0 : vector<8x128xf32>, i32 -> vector<8x128xf32>
    %59 = vector.broadcast %20 : vector<8x1xf32> to vector<8x128xf32>
    %60 = arith.mulf %58, %59 : vector<8x128xf32>
    %c7_i32_22 = arith.constant 7 : i32
    %61 = tpu.dynamic_rotate %57 by %c7_i32_22 dim 0 : vector<8x128xf32>, i32 -> vector<8x128xf32>
    %62 = vector.broadcast %24 : vector<8x1xf32> to vector<8x128xf32>
    %63 = arith.mulf %61, %62 : vector<8x128xf32>
    %64 = tpu.concatenate %60, %57, %63 in 1 : vector<8x128xf32>, vector<8x128xf32>, vector<8x128xf32> -> vector<8x384xf32>
    %c2 = arith.constant 2 : index
    %c0_23 = arith.constant 0 : index
    %c0_24 = arith.constant 0 : index
    %65 = vector.load %arg2[%c2, %c0_23, %c0_24] : memref<5x384x128xf32, #tpu.memory_space<vmem>>, vector<1x384x128xf32>
    %66 = vector.shape_cast %65 : vector<1x384x128xf32> to vector<384x128xf32>
    %cst_25 = arith.constant dense<0.000000e+00> : vector<8x128xf32>
    %67 = tpu.matmul %64, %66, %cst_25 {dimension_numbers = #tpu.dot_dimension_numbers<[1], [0], [0], [1], [0, 0, 1, 1], [], []>} : vector<8x384xf32>, vector<384x128xf32>, vector<8x128xf32> -> vector<8x128xf32>
    %c2_26 = arith.constant 2 : index
    %c0_27 = arith.constant 0 : index
    %c0_28 = arith.constant 0 : index
    %68 = vector.load %arg3[%c2_26, %c0_27, %c0_28] : memref<5x1x128xf32, #tpu.memory_space<vmem>>, vector<1x1x128xf32>
    %69 = vector.shape_cast %68 : vector<1x1x128xf32> to vector<1x128xf32>
    %70 = vector.broadcast %69 : vector<1x128xf32> to vector<8x128xf32>
    %71 = arith.addf %67, %70 : vector<8x128xf32>
    %72 = arith.addf %71, %57 : vector<8x128xf32>
    %73 = math.tanh %72 : vector<8x128xf32>
    %c1_i32_29 = arith.constant 1 : i32
    %74 = tpu.dynamic_rotate %73 by %c1_i32_29 dim 0 : vector<8x128xf32>, i32 -> vector<8x128xf32>
    %75 = vector.broadcast %20 : vector<8x1xf32> to vector<8x128xf32>
    %76 = arith.mulf %74, %75 : vector<8x128xf32>
    %c7_i32_30 = arith.constant 7 : i32
    %77 = tpu.dynamic_rotate %73 by %c7_i32_30 dim 0 : vector<8x128xf32>, i32 -> vector<8x128xf32>
    %78 = vector.broadcast %24 : vector<8x1xf32> to vector<8x128xf32>
    %79 = arith.mulf %77, %78 : vector<8x128xf32>
    %80 = tpu.concatenate %76, %73, %79 in 1 : vector<8x128xf32>, vector<8x128xf32>, vector<8x128xf32> -> vector<8x384xf32>
    %c3 = arith.constant 3 : index
    %c0_31 = arith.constant 0 : index
    %c0_32 = arith.constant 0 : index
    %81 = vector.load %arg2[%c3, %c0_31, %c0_32] : memref<5x384x128xf32, #tpu.memory_space<vmem>>, vector<1x384x128xf32>
    %82 = vector.shape_cast %81 : vector<1x384x128xf32> to vector<384x128xf32>
    %cst_33 = arith.constant dense<0.000000e+00> : vector<8x128xf32>
    %83 = tpu.matmul %80, %82, %cst_33 {dimension_numbers = #tpu.dot_dimension_numbers<[1], [0], [0], [1], [0, 0, 1, 1], [], []>} : vector<8x384xf32>, vector<384x128xf32>, vector<8x128xf32> -> vector<8x128xf32>
    %c3_34 = arith.constant 3 : index
    %c0_35 = arith.constant 0 : index
    %c0_36 = arith.constant 0 : index
    %84 = vector.load %arg3[%c3_34, %c0_35, %c0_36] : memref<5x1x128xf32, #tpu.memory_space<vmem>>, vector<1x1x128xf32>
    %85 = vector.shape_cast %84 : vector<1x1x128xf32> to vector<1x128xf32>
    %86 = vector.broadcast %85 : vector<1x128xf32> to vector<8x128xf32>
    %87 = arith.addf %83, %86 : vector<8x128xf32>
    %88 = arith.addf %87, %73 : vector<8x128xf32>
    %89 = math.tanh %88 : vector<8x128xf32>
    %c1_i32_37 = arith.constant 1 : i32
    %90 = tpu.dynamic_rotate %89 by %c1_i32_37 dim 0 : vector<8x128xf32>, i32 -> vector<8x128xf32>
    %91 = vector.broadcast %20 : vector<8x1xf32> to vector<8x128xf32>
    %92 = arith.mulf %90, %91 : vector<8x128xf32>
    %c7_i32_38 = arith.constant 7 : i32
    %93 = tpu.dynamic_rotate %89 by %c7_i32_38 dim 0 : vector<8x128xf32>, i32 -> vector<8x128xf32>
    %94 = vector.broadcast %24 : vector<8x1xf32> to vector<8x128xf32>
    %95 = arith.mulf %93, %94 : vector<8x128xf32>
    %96 = tpu.concatenate %92, %89, %95 in 1 : vector<8x128xf32>, vector<8x128xf32>, vector<8x128xf32> -> vector<8x384xf32>
    %c4 = arith.constant 4 : index
    %c0_39 = arith.constant 0 : index
    %c0_40 = arith.constant 0 : index
    %97 = vector.load %arg2[%c4, %c0_39, %c0_40] : memref<5x384x128xf32, #tpu.memory_space<vmem>>, vector<1x384x128xf32>
    %98 = vector.shape_cast %97 : vector<1x384x128xf32> to vector<384x128xf32>
    %cst_41 = arith.constant dense<0.000000e+00> : vector<8x128xf32>
    %99 = tpu.matmul %96, %98, %cst_41 {dimension_numbers = #tpu.dot_dimension_numbers<[1], [0], [0], [1], [0, 0, 1, 1], [], []>} : vector<8x384xf32>, vector<384x128xf32>, vector<8x128xf32> -> vector<8x128xf32>
    %c4_42 = arith.constant 4 : index
    %c0_43 = arith.constant 0 : index
    %c0_44 = arith.constant 0 : index
    %100 = vector.load %arg3[%c4_42, %c0_43, %c0_44] : memref<5x1x128xf32, #tpu.memory_space<vmem>>, vector<1x1x128xf32>
    %101 = vector.shape_cast %100 : vector<1x1x128xf32> to vector<1x128xf32>
    %102 = vector.broadcast %101 : vector<1x128xf32> to vector<8x128xf32>
    %103 = arith.addf %99, %102 : vector<8x128xf32>
    %104 = arith.addf %103, %89 : vector<8x128xf32>
    %105 = math.tanh %104 : vector<8x128xf32>
    %c0_45 = arith.constant 0 : index
    %c0_46 = arith.constant 0 : index
    %106 = vector.load %arg4[%c0_45, %c0_46] : memref<8x128xf32, #tpu.memory_space<vmem>>, vector<8x128xf32>
    tpu.vector_store %arg4[%c0_45, %c0_46], %105 {strides = array<i32>} : memref<8x128xf32, #tpu.memory_space<vmem>>, vector<8x128xf32>,
    return
  }
  func.func @transform_0(%arg0: i32) -> (i32, i32) {
    %c0_i32 = arith.constant 0 : i32
    %c0_i32_0 = arith.constant 0 : i32
    return %arg0, %c0_i32 : i32, i32
  }
  func.func @transform_1(%arg0: i32) -> (i32, i32, i32) {
    %c0_i32 = arith.constant 0 : i32
    %c0_i32_0 = arith.constant 0 : i32
    %c0_i32_1 = arith.constant 0 : i32
    %c0_i32_2 = arith.constant 0 : i32
    return %c0_i32, %c0_i32_0, %c0_i32_1 : i32, i32, i32
  }
  func.func @transform_2(%arg0: i32) -> (i32, i32, i32) {
    %c0_i32 = arith.constant 0 : i32
    %c0_i32_0 = arith.constant 0 : i32
    %c0_i32_1 = arith.constant 0 : i32
    %c0_i32_2 = arith.constant 0 : i32
    return %c0_i32, %c0_i32_0, %c0_i32_1 : i32, i32, i32
  }
  func.func @transform_3(%arg0: i32) -> (i32, i32) {
    %c0_i32 = arith.constant 0 : i32
    %c0_i32_0 = arith.constant 0 : i32
    return %arg0, %c0_i32 : i32, i32
  }
}

</mosaic_0001>

<bundles_post_ra>
// kernel: tpu_custom_call.1
= control target key start
LH: loop header
LB: loop body
LE: loop exit
PB: predicated region body
PF: predicated region fallthrough
CT: control target
= control target key end

     0   :  { %8 = vsyncpa [#allocation3], 0  ;;  %s2390_s0 = inlined_call_operand.hbm [shape: f32[16,128], index: 0, kind: input, shape index: {}]   ;;  %s2391_s1 = inlined_call_operand.hbm [shape: f32[5,384,128], index: 1, kind: input, shape index: {}]   ;;  %s2392_s2 = inlined_call_operand.hbm [shape: f32[5,1,128], index: 2, kind: input, shape index: {}]   ;;  %s2393_s3 = inlined_call_operand.hbm [shape: f32[16,128], index: 3, kind: output, shape index: {}]  }
   0x1   :  { %10 = vsyncpa [#allocation3 + $0x1], 0 }
   0x2   :  { %11 = vsyncpa [#allocation6], 0 }
   0x3   :  { %12 = vsyncpa [#allocation4], 0 }
   0x4   :  { %14 = vsyncpa [#allocation4 + $0x1], 0  ;;  %s2074_s12 = smov 0   ;;  %s2076_s13 = smov 0  }
   0x5   :  { %s2078_s14 = smov 0   ;;  %s2080_s15 = smov 0  }
   0x6 LB: > { %s2095_s16 = sadd.s32 4294967295, %s2042_s15   ;;  %s1353_s17 = sadd.s32 4294967294, %s2042_s15   ;;  %s2042_s15 = sphi %s2080_s15, %s2414_s15   ;;  %s2038_s14 = sphi %s2078_s14, %s2413_s14   ;;  %s2034_s13 = sphi %s2076_s13, %s2412_s13   ;;  %s2030_s12 = sphi %s2074_s12, %s2411_s12  }
   0x7   : > { %p40_p0 = scmp.ne.s32.totalorder %s2034_s13, %s2030_s12  ;;  %p2394_p1 = scmp.eq.s32.totalorder %s2095_s16, 0 }
   0x8   : > { %p106_p2 = scmp.eq.s32.totalorder %s2095_s16, 1  ;;  %p112_p3 = scmp.eq.s32.totalorder %s1353_s17, 1 }
   0x9   : > { %p2104_p4 = por %p2394_p1, %p40_p0  ;;  %p1354_p5 = scmp.ge.s32.totalorder %s2042_s15, 1 }
   0xa   : > { %p2109_p6 = por %p112_p3, %p40_p0  ;;  %p119_p7 = scmp.lt.s32.totalorder %s2042_s15, 3 }
   0xb   : > { %s2398_s18 = scalar_select %p2104_p4, 1, 0 }
   0xc   : > { %s2399_s19 = scalar_select %p2109_p6, 1, 0 }
   0xd   : > { %p2114_p8 = pnand %p1354_p5, %p119_p7  ;;  %s2044_s21 = smov [#allocation5]  }
   0xe   : > { %s131_s22 = sshll.u32 %s2044_s21, 4  ;;  %s2045_s24 = smov [#allocation7]   ;;  %s132_s22 = int_to_ptr.vmem [resolvable:$true] %s131_s22 }
   0xf   : > { %s2400_s20 = scalar_select %p2114_p8, 1, 0 }
  0x10   : > { %p1823_p9 = pneg %p2114_p8  ;;  %s144_s25 = sshll.u32 %s2045_s24, 4  ;;  %s2127_s25 = int_to_ptr.vmem [resolvable:$true] %s144_s25 }
  0x11   : > { %s1905_s26 = scalar_lea.vmem %s132_s22, 30720  ;;  %p1913_p5 = scmp.lt.s32.totalorder %s132_s22, %s132_s22 }
  0x12   : > { %p2123_p11 = pnand %p1823_p9, %p2394_p1  ;;  %p1906_p13 = scmp.ne.s32.totalorder %s132_s22, %s1905_s26 }
  0x13   : > { %p1914_p7 = scmp.lt.s32.totalorder %s1905_s26, %s1905_s26 }
  0x14   : > { %p1896_p12 = pneg %p2123_p11 }
  0x15   : > { %p1915_p9 = por %p1914_p7, %p1913_p5 }
  0x16   : > { %p1908_p0 = pnand %p1906_p13, %p1896_p12 }
  0x18   : > { %p1909_p3 = pneg %p1908_p0 }
  0x1a   : > { %p1916_p10 = pnand %p1915_p9, %p1909_p3 }
  0x1c   : > { %1919 = shalt.err (!%p1916_p10)
}
  0x1d   : > { %s2046_s27 = smov 128   ;;  %s2047_s28 = smov 8  }
  0x1e   : > { %1826 = dma.hbm_to_vmem [thread:$0]  (!%p2123_p11), %s2391_s1, 30720, %s132_s22, [#allocation6], %s2046_s27, %s2046_s27, %s2047_s28  }
  0x1f   : > { %s1931_s4 = scalar_lea.vmem %s2127_s25, 80  ;;  %s1938_s5 = scalar_lea.vmem %s2127_s25, 96 }
  0x20   : > { %p1932_p13 = scmp.ne.s32.totalorder %s2127_s25, %s1931_s4  ;;  %p1939_p10 = scmp.lt.s32.totalorder %s2127_s25, %s2127_s25 }
  0x21   : > { %p1940_p5 = scmp.lt.s32.totalorder %s1938_s5, %s1931_s4 }
  0x22   : > { %p1934_p0 = pnand %p1932_p13, %p1896_p12 }
  0x23   : > { %p1941_p7 = por %p1940_p5, %p1939_p10 }
  0x24   : > { %p1935_p3 = pneg %p1934_p0 }
  0x26   : > { %p1942_p9 = pnand %p1941_p7, %p1935_p3 }
  0x28   : > { %1945 = shalt.err (!%p1942_p9)
}
  0x29   : > { %s2048_s6 = smov 16   ;;  %s2049_s7 = smov 1  }
  0x2a   : > { %1829 = dma.hbm_to_vmem [thread:$0]  (!%p2123_p11), %s2392_s2, 80, %s2127_s25, [#allocation6], %s2048_s6, %s2048_s6, %s2049_s7  }
  0x2b   : > { %s2154_s10 = sadd.s32 1, %s2042_s15   ;;  %s27_s17 = sadd.s32 1, %s2038_s14 }
  0x2c   : > { %s24_s11 = ssub.s32 %s2042_s15, %s2154_s10  ;;  %p34_p13 = scmp.ne.s32.totalorder %s2038_s14, %s2034_s13 }
  0x2d   : > { %p25_p12 = scmp.eq.s32.totalorder %s24_s11, 0  ;;  %p35_p0 = scmp.eq.s32.totalorder %s2042_s15, 0 }
  0x2e   : > { %p2167_p10 = por %p106_p2, %p34_p13  ;;  %p1840_p5 = scmp.lt.s32.totalorder %s2042_s15, 2 }
  0x2f   : > { %s2163_s21 = scalar_select %p25_p12, %s2038_s14, %s27_s17  }
  0x30   : > { %p36_p3 = por %p35_p0, %p34_p13  ;;  %s158_s23 = sand.u32 1, %s2038_s14  }
  0x31   : > { %s2402_s22 = scalar_select %p2167_p10, 1, 0 }
  0x32   : > { %s1358_s24 = sshll.u32 %s158_s23, 3  ;;  %s1359_s25 = sshll.u32 %s2042_s15, 7 }
  0x33   : > { %s2177_s28 = scalar_lea.hbm %s2390_s0, %s1359_s25  ;;  %s162_s29 = scalar_lea.vmem [#allocation2], %s1358_s24 }
  0x34   : > { %s169_s30 = sshll.u32 %s162_s29, 4  ;;  %p2179_p11 = pnand %p1840_p5, %p36_p3  ;;  %s170_s30 = int_to_ptr.vmem [resolvable:$true] %s169_s30 }
  0x35   : > { %s159_s5 = scalar_lea.sflag [#allocation3], %s158_s23  ;;  %s1946_s6 = scalar_lea.hbm %s2177_s28, 128 }
  0x36   : > { %p1947_p2 = scmp.ne.s32.totalorder %s2177_s28, %s1946_s6  ;;  %p1948_p7 = pneg %p2179_p11 }
  0x37   : > { %s1951_s9 = scalar_lea.hbm %s2390_s0, 256  ;;  %p1952_p13 = scmp.lt.s32.totalorder %s2177_s28, %s2390_s0 }
  0x38   : > { %p1949_p9 = pnand %p1948_p7, %p1947_p2  ;;  %p1953_p0 = scmp.lt.s32.totalorder %s1951_s9, %s1946_s6 }
  0x3a   : > { %p1950_p12 = pneg %p1949_p9  ;;  %p1954_p3 = por %p1953_p0, %p1952_p13 }
  0x3c   : > { %p1955_p5 = pnand %p1954_p3, %p1950_p12 }
  0x3e   : > { %1958 = shalt.err (!%p1955_p5)
}
  0x3f   : > { %s1959_s24 = scalar_lea.vmem %s170_s30, 128  ;;  %s2050_s23 = smov [#allocation2]  }
  0x40   : > { %p1960_p1 = scmp.ne.s32.totalorder %s170_s30, %s1959_s24  ;;  %s1964_s25 = sshll.u32 %s2050_s23, 4  ;;  %s1965_s25 = int_to_ptr.vmem [resolvable:$false] %s1964_s25 }
  0x41   : > { %s1966_s26 = scalar_lea.vmem %s1965_s25, 256  ;;  %p1967_p2 = scmp.lt.s32.totalorder %s170_s30, %s1965_s25 }
  0x42   : > { %p1962_p6 = pnand %p1960_p1, %p1948_p7  ;;  %p1968_p9 = scmp.lt.s32.totalorder %s1966_s26, %s1959_s24 }
  0x44   : > { %p1963_p10 = pneg %p1962_p6  ;;  %p1969_p4 = por %p1968_p9, %p1967_p2 }
  0x46   : > { %p1970_p8 = pnand %p1969_p4, %p1963_p10 }
  0x48   : > { %1973 = shalt.err (!%p1970_p8)
}
  0x49   : > { %1833 = dma.hbm_to_vmem [thread:$0]  (!%p2179_p11), %s2177_s28, 128, %s170_s30, %s159_s5  }
  0x4a   : > { %p2404_p12 = scmp.ne.s32.totalorder %s2400_s20, 0 }
  0x4b   : > { %s2200_s27 = sand.u32 (!%p2404_p12), 1, %s2034_s13   ;;  %p2405_p1 = scmp.ne.s32.totalorder (!%p2404_p12), %s2398_s18, 0 }
  0x4c   : > { %178 = sbr.rel (%p2404_p12) target bundleno = 1233 (0x4d1), region = 32  ;;  %s1361_s29 = sshll.u32 (!%p2404_p12), %s2200_s27, 3 }
  0x4d   : > { %s181_s6 = scalar_lea.sflag (!%p2404_p12), [#allocation3], %s2200_s27  ;;  %s2206_s7 = scalar_lea.vmem (!%p2404_p12), [#allocation2], %s1361_s29 }
  0x51   : > { %2017 = dma.done.wait (%p2405_p1), %s181_s6, 128  }
  0x52   : > { %2019 = vsyncadd (%p2405_p1), %s181_s6, 4294967168  ;;  %p2406_p4 = scmp.eq.s32.totalorder %s2095_s16, 0 }
  0x54   : > { %2021 = dma.done.wait (%p2406_p4), [#allocation6], 30800   ;;  %p2407_p6 = pmov %p2406_p4 }
  0x55   : > { %v2051_v0 = vmov 0.0   ;;  %vm2052_vm0 = vmmov 0   ;;  %v271_v1 = vld [vmem:[#allocation5 + $0xf8] sm:$0xff]  ;;  %v270_v3 = vld [vmem:[#allocation5 + $0xf0] sm:$0xff]  ;;  %v269_v5 = vld [vmem:[#allocation5 + $0xe8] sm:$0xff]  ;;  %v215_v21 = vlaneseq  ;;  %s1373_s18 = sshll.u32 %s2095_s16, 7 }
  0x56   : > { %2023 = vsyncadd (%p2407_p6), [#allocation6], 4294936496  ;;  %1636 = vmatprep.subr.mxu1 %v2051_v0  ;;  %1668 = vmatprep.mubr.msk.f32.mxu1 %vm2052_vm0, %v2051_v0  ;;  %v255_v2 = vld [vmem:[#allocation5 + $0x78] sm:$0xff]  ;;  %v254_v4 = vld [vmem:[#allocation5 + $0x70] sm:$0xff]  ;;  %s214_s20 = scalar_lea.vmem [#allocation8], %s1361_s29  ;;  %s2353_s5 = scalar_lea.hbm %s2393_s3, %s1373_s18 }
  0x57   : > { %1376 = vmatprep.subr.mxu0 %v271_v1  ;;  %v287_v6 = vld [vmem:[#allocation5 + $0x178] sm:$0xff]  ;;  %v253_v7 = vld [vmem:[#allocation5 + $0x68] sm:$0xff]  ;;  %v286_v8 = vld [vmem:[#allocation5 + $0x170] sm:$0xff]  ;;  %v216_v28 = vshrl.u32 %v215_v21, 7  ;;  %s1264_s28 = sshll.u32 %s214_s20, 4  ;;  %s1251_s8 = scalar_lea.sflag [#allocation4], %s2200_s27  ;;  %s1265_s28 = int_to_ptr.vmem [resolvable:$true] %s1264_s28 }
  0x58   : > { %1377 = vmatpush3.msra.mxu0 %v255_v2  ;;  %1637 = vmatpush3.msra.mxu1 %v287_v6  ;;  %v268_v9 = vld [vmem:[#allocation5 + $0xe0] sm:$0xff]  ;;  %v285_v10 = vld [vmem:[#allocation5 + $0x168] sm:$0xff]  ;;  %v267_v12 = vld [vmem:[#allocation5 + $0xd8] sm:$0xff]  ;;  %s1974_s9 = scalar_lea.vmem %s1265_s28, 128  ;;  %p2408_p10 = scmp.ne.s32.totalorder %s2402_s22, 0 }
  0x59   : > { %1378 = vmatprep.subr.mxu0 %v270_v3  ;;  %1638 = vmatprep.subr.mxu1 %v2051_v0  ;;  %v252_v11 = vld [vmem:[#allocation5 + $0x60] sm:$0xff]  ;;  %v251_v14 = vld [vmem:[#allocation5 + $0x58] sm:$0xff]  ;;  %v266_v15 = vld [vmem:[#allocation5 + $0xd0] sm:$0xff]  ;;  %v221_v35 = vand.u32 7, %v216_v28  ;;  %p1975_p8 = scmp.ne.s32.totalorder %s1265_s28, %s1974_s9  ;;  %s2053_s11 = smov [#allocation8]  }
  0x5a   : > { %1379 = vmatpush3.msra.mxu0 %v254_v4  ;;  %1639 = vmatpush3.msra.mxu1 %v286_v8  ;;  %v284_v13 = vld [vmem:[#allocation5 + $0x160] sm:$0xff]  ;;  %v283_v16 = vld [vmem:[#allocation5 + $0x158] sm:$0xff]  ;;  %v250_v17 = vld [vmem:[#allocation5 + $0x50] sm:$0xff]  ;;  %s1978_s17 = sshll.u32 %s2053_s11, 4  ;;  %s1979_s17 = int_to_ptr.vmem [resolvable:$false] %s1978_s17 }
  0x5b   : > { %1380 = vmatprep.subr.mxu0 %v269_v5  ;;  %1640 = vmatprep.subr.mxu1 %v2051_v0  ;;  %v265_v18 = vld [vmem:[#allocation5 + $0xc8] sm:$0xff]  ;;  %v282_v19 = vld [vmem:[#allocation5 + $0x150] sm:$0xff]  ;;  %v264_v22 = vld [vmem:[#allocation5 + $0xc0] sm:$0xff]  ;;  %vm229_vm1 = vcmp.ge.s32.totalorder %v221_v35, 1  ;;  %vm232_vm2 = vcmp.lt.s32.totalorder %v221_v35, 7  ;;  %p1976_p11 = pnand %p1975_p8, %p2408_p10  ;;  %s1980_s16 = scalar_lea.vmem %s1979_s17, 256 }
  0x5c   : > { %1381 = vmatpush3.msra.mxu0 %v253_v7  ;;  %1641 = vmatpush3.msra.mxu1 %v285_v10  ;;  %v249_v20 = vld [vmem:[#allocation5 + $0x48] sm:$0xff]  ;;  %v248_v24 = vld [vmem:[#allocation5 + $0x40] sm:$0xff]  ;;  %v263_v25 = vld [vmem:[#allocation5 + $0xb8] sm:$0xff]  ;;  %v2236_v48 = vsel %vm229_vm1, 1.0, %v2051_v0  ;;  %v2241_v53 = vsel %vm232_vm2, 1.0, %v2051_v0  ;;  %p1981_p13 = scmp.lt.s32.totalorder %s1265_s28, %s1979_s17  ;;  %p1982_p0 = scmp.lt.s32.totalorder %s1980_s16, %s1974_s9 }
  0x5d   : > { %1382 = vmatprep.subr.mxu0 %v268_v9  ;;  %1642 = vmatprep.subr.mxu1 %v2051_v0  ;;  %v281_v23 = vld [vmem:[#allocation5 + $0x148] sm:$0xff]  ;;  %v280_v26 = vld [vmem:[#allocation5 + $0x140] sm:$0xff]  ;;  %v247_v27 = vld [vmem:[#allocation5 + $0x38] sm:$0xff]  ;;  %p1977_p7 = pneg %p1976_p11 }
  0x5e   : > { %1383 = vmatpush3.msra.mxu0 %v252_v11  ;;  %1643 = vmatpush3.msra.mxu1 %v284_v13  ;;  %v262_v29 = vld [vmem:[#allocation5 + $0xb0] sm:$0xff]  ;;  %v279_v30 = vld [vmem:[#allocation5 + $0x138] sm:$0xff]  ;;  %v261_v32 = vld [vmem:[#allocation5 + $0xa8] sm:$0xff]  ;;  %p1983_p3 = por %p1982_p0, %p1981_p13 }
  0x5f   : > { %1384 = vmatprep.subr.mxu0 %v267_v12  ;;  %1644 = vmatprep.subr.mxu1 %v2051_v0  ;;  %v246_v31 = vld [vmem:[#allocation5 + $0x30] sm:$0xff]  ;;  %v245_v34 = vld [vmem:[#allocation5 + $0x28] sm:$0xff]  ;;  %v260_v36 = vld [vmem:[#allocation5 + $0xa0] sm:$0xff] }
  0x60   : > { %1385 = vmatpush3.msra.mxu0 %v251_v14  ;;  %1645 = vmatpush3.msra.mxu1 %v283_v16  ;;  %v278_v33 = vld [vmem:[#allocation5 + $0x130] sm:$0xff]  ;;  %v277_v37 = vld [vmem:[#allocation5 + $0x128] sm:$0xff]  ;;  %v244_v38 = vld [vmem:[#allocation5 + $0x20] sm:$0xff]  ;;  %p1984_p5 = pnand %p1983_p3, %p1977_p7 }
  0x61   : > { %1386 = vmatprep.subr.mxu0 %v266_v15  ;;  %1646 = vmatprep.subr.mxu1 %v2051_v0  ;;  %v259_v39 = vld [vmem:[#allocation5 + $0x98] sm:$0xff]  ;;  %v276_v40 = vld [vmem:[#allocation5 + $0x120] sm:$0xff]  ;;  %v258_v43 = vld [vmem:[#allocation5 + $0x90] sm:$0xff] }
  0x62   : > { %1387 = vmatpush3.msra.mxu0 %v250_v17  ;;  %1647 = vmatpush3.msra.mxu1 %v282_v19  ;;  %v2230_v41 = vld [vmem:[%s2206_s7] sm:$0xff]  ;;  %v257_v47 = vld [vmem:[#allocation5 + $0x88] sm:$0xff]  ;;  %v256_v52 = vld [vmem:[#allocation5 + $0x80] sm:$0xff] }
  0x63   : > { %1388 = vmatprep.subr.mxu0 %v265_v18  ;;  %1648 = vmatprep.subr.mxu1 %v2051_v0  ;;  %v243_v42 = vld [vmem:[#allocation5 + $0x18] sm:$0xff]  ;;  %v242_v45 = vld [vmem:[#allocation5 + $0x10] sm:$0xff]  ;;  %v236_v46 = vrot.slane %v2230_v41, 7  ;;  %v241_v49 = vld [vmem:[#allocation5 + $0x8] sm:$0xff]  ;;  %v238_v51 = vrot.slane %v2230_v41, 1 }
  0x64   : > { %1389 = vmatpush3.msra.mxu0 %v249_v20  ;;  %1649 = vmatpush3.msra.mxu1 %v281_v23  ;;  %v275_v44 = vld [vmem:[#allocation5 + $0x118] sm:$0xff]  ;;  %v274_v50 = vld [vmem:[#allocation5 + $0x110] sm:$0xff]  ;;  %v240_v54 = vld [vmem:[#allocation5] sm:$0xff] }
  0x65   : > { %1390 = vmatprep.subr.mxu0 %v264_v22  ;;  %1650 = vmatprep.subr.mxu1 %v2051_v0  ;;  %v237_v55 = vmul.f32 %v2236_v48, %v236_v46  ;;  %v273_v56 = vld [vmem:[#allocation5 + $0x108] sm:$0xff]  ;;  %v272_v57 = vld [vmem:[#allocation5 + $0x100] sm:$0xff]  ;;  %v239_v58 = vmul.f32 %v2241_v53, %v238_v51  ;;  %v473_v59 = vld [vmem:[#allocation5 + $0x278] sm:$0xff] }
  0x66   : > { %1391 = vmatpush3.msra.mxu0 %v248_v24  ;;  %1651 = vmatpush3.msra.mxu1 %v280_v26  ;;  %v457_v60 = vld [vmem:[#allocation5 + $0x1f8] sm:$0xff]  ;;  %v472_v62 = vld [vmem:[#allocation5 + $0x270] sm:$0xff]  ;;  %v471_v2 = vld [vmem:[#allocation5 + $0x268] sm:$0xff] }
  0x67   : > { %1392 = vmatprep.subr.mxu0 %v263_v25  ;;  %1652 = vmatprep.subr.mxu1 %v2051_v0  ;;  %v489_v61 = vld [vmem:[#allocation5 + $0x2f8] sm:$0xff]  ;;  %v456_v63 = vld [vmem:[#allocation5 + $0x1f0] sm:$0xff]  ;;  %v455_v3 = vld [vmem:[#allocation5 + $0x1e8] sm:$0xff] }
  0x68   : > { %1393 = vmatpush3.msra.mxu0 %v247_v27  ;;  %1653 = vmatpush3.msra.mxu1 %v279_v30  ;;  %v488_v1 = vld [vmem:[#allocation5 + $0x2f0] sm:$0xff]  ;;  %v487_v4 = vld [vmem:[#allocation5 + $0x2e8] sm:$0xff]  ;;  %v470_v5 = vld [vmem:[#allocation5 + $0x260] sm:$0xff] }
  0x69   : > { %1394 = vmatprep.subr.mxu0 %v262_v29  ;;  %1654 = vmatprep.subr.mxu1 %v2051_v0  ;;  %v454_v6 = vld [vmem:[#allocation5 + $0x1e0] sm:$0xff]  ;;  %v469_v8 = vld [vmem:[#allocation5 + $0x258] sm:$0xff]  ;;  %v468_v11 = vld [vmem:[#allocation5 + $0x250] sm:$0xff] }
  0x6a   : > { %1395 = vmatpush3.msra.mxu0 %v246_v31  ;;  %1655 = vmatpush3.msra.mxu1 %v278_v33  ;;  %v486_v7 = vld [vmem:[#allocation5 + $0x2e0] sm:$0xff]  ;;  %v453_v9 = vld [vmem:[#allocation5 + $0x1d8] sm:$0xff]  ;;  %v452_v12 = vld [vmem:[#allocation5 + $0x1d0] sm:$0xff] }
  0x6b   : > { %1396 = vmatprep.subr.mxu0 %v261_v32  ;;  %1656 = vmatprep.subr.mxu1 %v2051_v0  ;;  %v485_v10 = vld [vmem:[#allocation5 + $0x2d8] sm:$0xff]  ;;  %v484_v13 = vld [vmem:[#allocation5 + $0x2d0] sm:$0xff]  ;;  %v467_v14 = vld [vmem:[#allocation5 + $0x248] sm:$0xff] }
  0x6c   : > { %1397 = vmatpush3.msra.mxu0 %v245_v34  ;;  %1657 = vmatpush3.msra.mxu1 %v277_v37  ;;  %v451_v15 = vld [vmem:[#allocation5 + $0x1c8] sm:$0xff]  ;;  %v466_v17 = vld [vmem:[#allocation5 + $0x240] sm:$0xff]  ;;  %v465_v20 = vld [vmem:[#allocation5 + $0x238] sm:$0xff] }
  0x6d   : > { %1398 = vmatprep.subr.mxu0 %v260_v36  ;;  %1658 = vmatprep.subr.mxu1 %v2051_v0  ;;  %v483_v16 = vld [vmem:[#allocation5 + $0x2c8] sm:$0xff]  ;;  %v450_v18 = vld [vmem:[#allocation5 + $0x1c0] sm:$0xff]  ;;  %v449_v21 = vld [vmem:[#allocation5 + $0x1b8] sm:$0xff] }
  0x6e   : > { %1399 = vmatpush3.msra.mxu0 %v244_v38  ;;  %1659 = vmatpush3.msra.mxu1 %v276_v40  ;;  %v482_v19 = vld [vmem:[#allocation5 + $0x2c0] sm:$0xff]  ;;  %v481_v22 = vld [vmem:[#allocation5 + $0x2b8] sm:$0xff]  ;;  %v464_v23 = vld [vmem:[#allocation5 + $0x230] sm:$0xff] }
  0x6f   : > { %1400 = vmatprep.subr.mxu0 %v259_v39  ;;  %1660 = vmatprep.subr.mxu1 %v2051_v0  ;;  %v448_v24 = vld [vmem:[#allocation5 + $0x1b0] sm:$0xff]  ;;  %v463_v26 = vld [vmem:[#allocation5 + $0x228] sm:$0xff]  ;;  %v462_v29 = vld [vmem:[#allocation5 + $0x220] sm:$0xff] }
  0x70   : > { %1401 = vmatpush3.msra.mxu0 %v243_v42  ;;  %1661 = vmatpush3.msra.mxu1 %v275_v44  ;;  %v480_v25 = vld [vmem:[#allocation5 + $0x2b0] sm:$0xff]  ;;  %v447_v27 = vld [vmem:[#allocation5 + $0x1a8] sm:$0xff]  ;;  %v446_v30 = vld [vmem:[#allocation5 + $0x1a0] sm:$0xff] }
  0x71   : > { %1402 = vmatprep.subr.mxu0 %v258_v43  ;;  %1662 = vmatprep.subr.mxu1 %v2051_v0  ;;  %v479_v28 = vld [vmem:[#allocation5 + $0x2a8] sm:$0xff]  ;;  %v478_v31 = vld [vmem:[#allocation5 + $0x2a0] sm:$0xff]  ;;  %v461_v32 = vld [vmem:[#allocation5 + $0x218] sm:$0xff] }
  0x72   : > { %1403 = vmatpush3.msra.mxu0 %v242_v45  ;;  %359 = vmatprep.mubr.f32.mxu0 %v2230_v41  ;;  %v445_v33 = vld [vmem:[#allocation5 + $0x198] sm:$0xff]  ;;  %v460_v35 = vld [vmem:[#allocation5 + $0x210] sm:$0xff]  ;;  %v459_v38 = vld [vmem:[#allocation5 + $0x208] sm:$0xff] }
  0x73   : > { %1404 = vmatprep.subr.mxu0 %v257_v47  ;;  %1663 = vmatpush3.msra.mxu1 %v274_v50  ;;  %v477_v34 = vld [vmem:[#allocation5 + $0x298] sm:$0xff]  ;;  %v444_v36 = vld [vmem:[#allocation5 + $0x190] sm:$0xff]  ;;  %v443_v39 = vld [vmem:[#allocation5 + $0x188] sm:$0xff] }
  0x74   : > { %1405 = vmatpush3.msra.mxu0 %v241_v49  ;;  %1664 = vmatprep.subr.mxu1 %v2051_v0  ;;  %v476_v37 = vld [vmem:[#allocation5 + $0x290] sm:$0xff]  ;;  %v475_v40 = vld [vmem:[#allocation5 + $0x288] sm:$0xff]  ;;  %v458_v42 = vld [vmem:[#allocation5 + $0x200] sm:$0xff] }
  0x75   : > { %1406 = vmatprep.subr.mxu0 %v256_v52  ;;  %1665 = vmatpush3.msra.mxu1 %v273_v56  ;;  %v442_v43 = vld [vmem:[#allocation5 + $0x180] sm:$0xff]  ;;  %v676_v45 = vld [vmem:[#allocation5 + $0x3f8] sm:$0xff] }
  0x76   : > { %1407 = vmatpush3.msra.mxu0 %v240_v54  ;;  %1666 = vmatprep.subr.mxu1 %v2051_v0  ;;  %v474_v44 = vld [vmem:[#allocation5 + $0x280] sm:$0xff] }
  0x77   : > { %360 = vmatmul.mubr.f32.vlgmr.msra.gmra.mxu0 %v237_v55  ;;  %1667 = vmatpush3.msra.mxu1 %v272_v57  ;;  %v1367_v49 = vld [vmem:[#allocation7] ss:$0 sm:$0xff] }
  0x78   : > { %1428 = vmatprep.subr.mxu0 %v473_v59  ;;  %1669 = vmatmul.mubr.f32.vlgmr.msra.gmra.mxu1 %v239_v58 }
  0x79   : > { %1671 = vmatprep.subr.mxu1 %v2051_v0  ;;  %1429 = vmatpush3.msra.mxu0 %v457_v60 }
  0x7a   : > { %1672 = vmatpush3.msra.mxu1 %v489_v61  ;;  %1430 = vmatprep.subr.mxu0 %v472_v62  ;;  %v660_v62 = vld [vmem:[#allocation5 + $0x378] sm:$0xff] }
  0x7b   : > { %1673 = vmatprep.subr.mxu1 %v2051_v0  ;;  %1703 = vmatprep.mubr.msk.f32.mxu1 %vm2052_vm0, %v2051_v0 }
  0x7c   : > { %1431 = vmatpush3.msra.mxu0 %v456_v63  ;;  %1674 = vmatpush3.msra.mxu1 %v488_v1  ;;  %v692_v63 = vld [vmem:[#allocation5 + $0x478] sm:$0xff]  ;;  %v675_v1 = vld [vmem:[#allocation5 + $0x3f0] sm:$0xff] }
  0x7d   : > { %1432 = vmatprep.subr.mxu0 %v471_v2  ;;  %1675 = vmatprep.subr.mxu1 %v2051_v0  ;;  %v691_v2 = vld [vmem:[#allocation5 + $0x470] sm:$0xff] }
  0x7e   : > { %1433 = vmatpush3.msra.mxu0 %v455_v3  ;;  %1676 = vmatpush3.msra.mxu1 %v487_v4  ;;  %v674_v3 = vld [vmem:[#allocation5 + $0x3e8] sm:$0xff] }
  0x7f   : > { %1434 = vmatprep.subr.mxu0 %v470_v5  ;;  %1677 = vmatprep.subr.mxu1 %v2051_v0  ;;  %v658_v4 = vld [vmem:[#allocation5 + $0x368] sm:$0xff] }
  0x80   : > { %1435 = vmatpush3.msra.mxu0 %v454_v6  ;;  %1678 = vmatpush3.msra.mxu1 %v486_v7  ;;  %v690_v5 = vld [vmem:[#allocation5 + $0x468] sm:$0xff]  ;;  %v673_v6 = vld [vmem:[#allocation5 + $0x3e0] sm:$0xff] }
  0x81   : > { %1436 = vmatprep.subr.mxu0 %v469_v8  ;;  %1679 = vmatprep.subr.mxu1 %v2051_v0  ;;  %v657_v7 = vld [vmem:[#allocation5 + $0x360] sm:$0xff] }
  0x82   : > { %1437 = vmatpush3.msra.mxu0 %v453_v9  ;;  %1680 = vmatpush3.msra.mxu1 %v485_v10  ;;  %v689_v8 = vld [vmem:[#allocation5 + $0x460] sm:$0xff]  ;;  %v672_v9 = vld [vmem:[#allocation5 + $0x3d8] sm:$0xff] }
  0x83   : > { %1438 = vmatprep.subr.mxu0 %v468_v11  ;;  %1681 = vmatprep.subr.mxu1 %v2051_v0  ;;  %v656_v10 = vld [vmem:[#allocation5 + $0x358] sm:$0xff] }
  0x84   : > { %1439 = vmatpush3.msra.mxu0 %v452_v12  ;;  %1682 = vmatpush3.msra.mxu1 %v484_v13  ;;  %v688_v11 = vld [vmem:[#allocation5 + $0x458] sm:$0xff]  ;;  %v671_v12 = vld [vmem:[#allocation5 + $0x3d0] sm:$0xff] }
  0x85   : > { %1440 = vmatprep.subr.mxu0 %v467_v14  ;;  %1683 = vmatprep.subr.mxu1 %v2051_v0  ;;  %v655_v13 = vld [vmem:[#allocation5 + $0x350] sm:$0xff] }
  0x86   : > { %1441 = vmatpush3.msra.mxu0 %v451_v15  ;;  %1684 = vmatpush3.msra.mxu1 %v483_v16  ;;  %v687_v14 = vld [vmem:[#allocation5 + $0x450] sm:$0xff]  ;;  %v670_v15 = vld [vmem:[#allocation5 + $0x3c8] sm:$0xff] }
  0x87   : > { %1442 = vmatprep.subr.mxu0 %v466_v17  ;;  %1685 = vmatprep.subr.mxu1 %v2051_v0  ;;  %v654_v16 = vld [vmem:[#allocation5 + $0x348] sm:$0xff] }
  0x88   : > { %1443 = vmatpush3.msra.mxu0 %v450_v18  ;;  %1686 = vmatpush3.msra.mxu1 %v482_v19  ;;  %v686_v17 = vld [vmem:[#allocation5 + $0x448] sm:$0xff]  ;;  %v669_v18 = vld [vmem:[#allocation5 + $0x3c0] sm:$0xff] }
  0x89   : > { %1444 = vmatprep.subr.mxu0 %v465_v20  ;;  %1687 = vmatprep.subr.mxu1 %v2051_v0  ;;  %v653_v19 = vld [vmem:[#allocation5 + $0x340] sm:$0xff] }
  0x8a   : > { %1445 = vmatpush3.msra.mxu0 %v449_v21  ;;  %1688 = vmatpush3.msra.mxu1 %v481_v22  ;;  %v685_v20 = vld [vmem:[#allocation5 + $0x440] sm:$0xff]  ;;  %v668_v21 = vld [vmem:[#allocation5 + $0x3b8] sm:$0xff] }
  0x8b   : > { %1446 = vmatprep.subr.mxu0 %v464_v23  ;;  %1689 = vmatprep.subr.mxu1 %v2051_v0  ;;  %v652_v22 = vld [vmem:[#allocation5 + $0x338] sm:$0xff] }
  0x8c   : > { %1447 = vmatpush3.msra.mxu0 %v448_v24  ;;  %1690 = vmatpush3.msra.mxu1 %v480_v25  ;;  %v684_v23 = vld [vmem:[#allocation5 + $0x438] sm:$0xff]  ;;  %v667_v24 = vld [vmem:[#allocation5 + $0x3b0] sm:$0xff] }
  0x8d   : > { %1448 = vmatprep.subr.mxu0 %v463_v26  ;;  %1691 = vmatprep.subr.mxu1 %v2051_v0  ;;  %v651_v25 = vld [vmem:[#allocation5 + $0x330] sm:$0xff] }
  0x8e   : > { %1449 = vmatpush3.msra.mxu0 %v447_v27  ;;  %1692 = vmatpush3.msra.mxu1 %v479_v28  ;;  %v683_v26 = vld [vmem:[#allocation5 + $0x430] sm:$0xff]  ;;  %v666_v27 = vld [vmem:[#allocation5 + $0x3a8] sm:$0xff] }
  0x8f   : > { %1450 = vmatprep.subr.mxu0 %v462_v29  ;;  %1693 = vmatprep.subr.mxu1 %v2051_v0  ;;  %v650_v28 = vld [vmem:[#allocation5 + $0x328] sm:$0xff] }
  0x90   : > { %1451 = vmatpush3.msra.mxu0 %v446_v30  ;;  %1694 = vmatpush3.msra.mxu1 %v478_v31  ;;  %v682_v29 = vld [vmem:[#allocation5 + $0x428] sm:$0xff]  ;;  %v665_v30 = vld [vmem:[#allocation5 + $0x3a0] sm:$0xff] }
  0x91   : > { %1452 = vmatprep.subr.mxu0 %v461_v32  ;;  %1695 = vmatprep.subr.mxu1 %v2051_v0  ;;  %v649_v31 = vld [vmem:[#allocation5 + $0x320] sm:$0xff] }
  0x92   : > { %1453 = vmatpush3.msra.mxu0 %v445_v33  ;;  %1696 = vmatpush3.msra.mxu1 %v477_v34  ;;  %v681_v32 = vld [vmem:[#allocation5 + $0x420] sm:$0xff]  ;;  %v664_v33 = vld [vmem:[#allocation5 + $0x398] sm:$0xff] }
  0x93   : > { %1454 = vmatprep.subr.mxu0 %v460_v35  ;;  %1697 = vmatprep.subr.mxu1 %v2051_v0  ;;  %v648_v34 = vld [vmem:[#allocation5 + $0x318] sm:$0xff] }
  0x94   : > { %1455 = vmatpush3.msra.mxu0 %v444_v36  ;;  %1698 = vmatpush3.msra.mxu1 %v476_v37  ;;  %v680_v35 = vld [vmem:[#allocation5 + $0x418] sm:$0xff]  ;;  %v663_v36 = vld [vmem:[#allocation5 + $0x390] sm:$0xff] }
  0x95   : > { %1456 = vmatprep.subr.mxu0 %v459_v38  ;;  %1699 = vmatprep.subr.mxu1 %v2051_v0  ;;  %v647_v37 = vld [vmem:[#allocation5 + $0x310] sm:$0xff] }
  0x96   : > { %1457 = vmatpush3.msra.mxu0 %v443_v39  ;;  %1700 = vmatpush3.msra.mxu1 %v475_v40  ;;  %v679_v38 = vld [vmem:[#allocation5 + $0x410] sm:$0xff]  ;;  %v662_v39 = vld [vmem:[#allocation5 + $0x388] sm:$0xff] }
  0x97   : > { %1458 = vmatprep.subr.mxu0 %v458_v42  ;;  %1701 = vmatprep.subr.mxu1 %v2051_v0  ;;  %v646_v40 = vld [vmem:[#allocation5 + $0x308] sm:$0xff] }
  0x98   : > { %1459 = vmatpush3.msra.mxu0 %v442_v43  ;;  %1702 = vmatpush3.msra.mxu1 %v474_v44  ;;  %v678_v42 = vld [vmem:[#allocation5 + $0x408] sm:$0xff]  ;;  %v661_v43 = vld [vmem:[#allocation5 + $0x380] sm:$0xff] }
  0x99   : > { %1706 = vmatprep.subr.mxu1 %v2051_v0  ;;  %1480 = vmatprep.subr.mxu0 %v676_v45  ;;  %v645_v44 = vld [vmem:[#allocation5 + $0x300] sm:$0xff] }
  0x9a   : > { %v677_v45 = vld [vmem:[#allocation5 + $0x400] sm:$0xff] }
 0x137   : > { %v1408_v46 = vpop.f32.mrf.mxu0 }
 0x138   : > { %v431_v50 = vpop.f32.mrf.mxu1 }
 0x139   : > { %v1409_v47 = vpop.f32.mrf.mxu0 }
 0x13a   : > { %v1410_v51 = vadd.f32 %v1409_v47, %v1408_v46  ;;  %v1670_v52 = vpop.f32.mrf.mxu1  ;;  %v879_v46 = vld [vmem:[#allocation5 + $0x578] sm:$0xff] }
 0x13c   : > { %v362_v54 = vadd.f32 %v1410_v51, %v1367_v49 }
 0x13e   : > { %v432_v55 = vadd.f32 %v431_v50, %v362_v54  ;;  %v1368_v50 = vld [vmem:[#allocation7 + $0x1] ss:$0 sm:$0xff] }
 0x140   : > { %v435_v56 = vadd.f32 %v432_v55, %v2230_v41  ;;  %v659_v41 = vld [vmem:[#allocation5 + $0x370] sm:$0xff] }
 0x142   : > { %1884 = vtanh.f32 %v435_v56 }
 0x14f   : > { %v2268_v57 = vpop.eup %1884 }
 0x150   : > { %562 = vmatprep.mubr.f32.mxu0 %v2268_v57  ;;  %v437_v58 = vrot.slane %v2268_v57, 7  ;;  %v439_v59 = vrot.slane %v2268_v57, 1 }
 0x152   : > { %v438_v60 = vmul.f32 %v2236_v48, %v437_v58  ;;  %v440_v61 = vmul.f32 %v2241_v53, %v439_v59 }
 0x154   : > { %563 = vmatmul.mubr.f32.vlgmr.msra.gmra.mxu0 %v438_v60  ;;  %1704 = vmatmul.mubr.f32.vlgmr.msra.gmra.mxu1 %v440_v61 }
 0x155   : > { %1481 = vmatpush3.msra.mxu0 %v660_v62  ;;  %1707 = vmatpush3.msra.mxu1 %v692_v63 }
 0x156   : > { %1482 = vmatprep.subr.mxu0 %v675_v1  ;;  %1708 = vmatprep.subr.mxu1 %v2051_v0  ;;  %v863_v1 = vld [vmem:[#allocation5 + $0x4f8] sm:$0xff] }
 0x157   : > { %1738 = vmatprep.mubr.msk.f32.mxu1 %vm2052_vm0, %v2051_v0  ;;  %1483 = vmatpush3.msra.mxu0 %v659_v41  ;;  %v895_v41 = vld [vmem:[#allocation5 + $0x5f8] sm:$0xff] }
 0x158   : > { %1709 = vmatpush3.msra.mxu1 %v691_v2  ;;  %1484 = vmatprep.subr.mxu0 %v674_v3  ;;  %v878_v2 = vld [vmem:[#allocation5 + $0x570] sm:$0xff] }
 0x159   : > { %1710 = vmatprep.subr.mxu1 %v2051_v0  ;;  %1485 = vmatpush3.msra.mxu0 %v658_v4  ;;  %v894_v3 = vld [vmem:[#allocation5 + $0x5f0] sm:$0xff]  ;;  %v877_v4 = vld [vmem:[#allocation5 + $0x568] sm:$0xff] }
 0x15a   : > { %1711 = vmatpush3.msra.mxu1 %v690_v5  ;;  %1486 = vmatprep.subr.mxu0 %v673_v6  ;;  %v861_v5 = vld [vmem:[#allocation5 + $0x4e8] sm:$0xff] }
 0x15b   : > { %1712 = vmatprep.subr.mxu1 %v2051_v0  ;;  %1487 = vmatpush3.msra.mxu0 %v657_v7  ;;  %v893_v6 = vld [vmem:[#allocation5 + $0x5e8] sm:$0xff]  ;;  %v876_v7 = vld [vmem:[#allocation5 + $0x560] sm:$0xff] }
 0x15c   : > { %1713 = vmatpush3.msra.mxu1 %v689_v8  ;;  %1488 = vmatprep.subr.mxu0 %v672_v9  ;;  %v860_v8 = vld [vmem:[#allocation5 + $0x4e0] sm:$0xff] }
 0x15d   : > { %1714 = vmatprep.subr.mxu1 %v2051_v0  ;;  %1489 = vmatpush3.msra.mxu0 %v656_v10  ;;  %v892_v9 = vld [vmem:[#allocation5 + $0x5e0] sm:$0xff]  ;;  %v875_v10 = vld [vmem:[#allocation5 + $0x558] sm:$0xff] }
 0x15e   : > { %1715 = vmatpush3.msra.mxu1 %v688_v11  ;;  %1490 = vmatprep.subr.mxu0 %v671_v12  ;;  %v859_v11 = vld [vmem:[#allocation5 + $0x4d8] sm:$0xff] }
 0x15f   : > { %1716 = vmatprep.subr.mxu1 %v2051_v0  ;;  %1491 = vmatpush3.msra.mxu0 %v655_v13  ;;  %v891_v12 = vld [vmem:[#allocation5 + $0x5d8] sm:$0xff]  ;;  %v874_v13 = vld [vmem:[#allocation5 + $0x550] sm:$0xff] }
 0x160   : > { %1717 = vmatpush3.msra.mxu1 %v687_v14  ;;  %1492 = vmatprep.subr.mxu0 %v670_v15  ;;  %v858_v14 = vld [vmem:[#allocation5 + $0x4d0] sm:$0xff] }
 0x161   : > { %1718 = vmatprep.subr.mxu1 %v2051_v0  ;;  %1493 = vmatpush3.msra.mxu0 %v654_v16  ;;  %v890_v15 = vld [vmem:[#allocation5 + $0x5d0] sm:$0xff]  ;;  %v873_v16 = vld [vmem:[#allocation5 + $0x548] sm:$0xff] }
 0x162   : > { %1719 = vmatpush3.msra.mxu1 %v686_v17  ;;  %1494 = vmatprep.subr.mxu0 %v669_v18  ;;  %v857_v17 = vld [vmem:[#allocation5 + $0x4c8] sm:$0xff] }
 0x163   : > { %1720 = vmatprep.subr.mxu1 %v2051_v0  ;;  %1495 = vmatpush3.msra.mxu0 %v653_v19  ;;  %v889_v18 = vld [vmem:[#allocation5 + $0x5c8] sm:$0xff]  ;;  %v872_v19 = vld [vmem:[#allocation5 + $0x540] sm:$0xff] }
 0x164   : > { %1721 = vmatpush3.msra.mxu1 %v685_v20  ;;  %1496 = vmatprep.subr.mxu0 %v668_v21  ;;  %v856_v20 = vld [vmem:[#allocation5 + $0x4c0] sm:$0xff] }
 0x165   : > { %1722 = vmatprep.subr.mxu1 %v2051_v0  ;;  %1497 = vmatpush3.msra.mxu0 %v652_v22  ;;  %v888_v21 = vld [vmem:[#allocation5 + $0x5c0] sm:$0xff]  ;;  %v871_v22 = vld [vmem:[#allocation5 + $0x538] sm:$0xff] }
 0x166   : > { %1723 = vmatpush3.msra.mxu1 %v684_v23  ;;  %1498 = vmatprep.subr.mxu0 %v667_v24  ;;  %v855_v23 = vld [vmem:[#allocation5 + $0x4b8] sm:$0xff] }
 0x167   : > { %1724 = vmatprep.subr.mxu1 %v2051_v0  ;;  %1499 = vmatpush3.msra.mxu0 %v651_v25  ;;  %v887_v24 = vld [vmem:[#allocation5 + $0x5b8] sm:$0xff]  ;;  %v870_v25 = vld [vmem:[#allocation5 + $0x530] sm:$0xff] }
 0x168   : > { %1725 = vmatpush3.msra.mxu1 %v683_v26  ;;  %1500 = vmatprep.subr.mxu0 %v666_v27  ;;  %v854_v26 = vld [vmem:[#allocation5 + $0x4b0] sm:$0xff] }
 0x169   : > { %1726 = vmatprep.subr.mxu1 %v2051_v0  ;;  %1501 = vmatpush3.msra.mxu0 %v650_v28  ;;  %v886_v27 = vld [vmem:[#allocation5 + $0x5b0] sm:$0xff]  ;;  %v869_v28 = vld [vmem:[#allocation5 + $0x528] sm:$0xff] }
 0x16a   : > { %1727 = vmatpush3.msra.mxu1 %v682_v29  ;;  %1502 = vmatprep.subr.mxu0 %v665_v30  ;;  %v853_v29 = vld [vmem:[#allocation5 + $0x4a8] sm:$0xff] }
 0x16b   : > { %1728 = vmatprep.subr.mxu1 %v2051_v0  ;;  %1503 = vmatpush3.msra.mxu0 %v649_v31  ;;  %v885_v30 = vld [vmem:[#allocation5 + $0x5a8] sm:$0xff]  ;;  %v868_v31 = vld [vmem:[#allocation5 + $0x520] sm:$0xff] }
 0x16c   : > { %1729 = vmatpush3.msra.mxu1 %v681_v32  ;;  %1504 = vmatprep.subr.mxu0 %v664_v33  ;;  %v852_v32 = vld [vmem:[#allocation5 + $0x4a0] sm:$0xff] }
 0x16d   : > { %1730 = vmatprep.subr.mxu1 %v2051_v0  ;;  %1505 = vmatpush3.msra.mxu0 %v648_v34  ;;  %v884_v33 = vld [vmem:[#allocation5 + $0x5a0] sm:$0xff]  ;;  %v867_v34 = vld [vmem:[#allocation5 + $0x518] sm:$0xff] }
 0x16e   : > { %1731 = vmatpush3.msra.mxu1 %v680_v35  ;;  %1506 = vmatprep.subr.mxu0 %v663_v36  ;;  %v851_v35 = vld [vmem:[#allocation5 + $0x498] sm:$0xff] }
 0x16f   : > { %1732 = vmatprep.subr.mxu1 %v2051_v0  ;;  %1507 = vmatpush3.msra.mxu0 %v647_v37  ;;  %v883_v36 = vld [vmem:[#allocation5 + $0x598] sm:$0xff]  ;;  %v866_v37 = vld [vmem:[#allocation5 + $0x510] sm:$0xff] }
 0x170   : > { %1733 = vmatpush3.msra.mxu1 %v679_v38  ;;  %1508 = vmatprep.subr.mxu0 %v662_v39  ;;  %v850_v38 = vld [vmem:[#allocation5 + $0x490] sm:$0xff] }
 0x171   : > { %1734 = vmatprep.subr.mxu1 %v2051_v0  ;;  %1509 = vmatpush3.msra.mxu0 %v646_v40  ;;  %v882_v39 = vld [vmem:[#allocation5 + $0x590] sm:$0xff]  ;;  %v865_v40 = vld [vmem:[#allocation5 + $0x508] sm:$0xff] }
 0x172   : > { %1735 = vmatpush3.msra.mxu1 %v678_v42  ;;  %1510 = vmatprep.subr.mxu0 %v661_v43  ;;  %v849_v42 = vld [vmem:[#allocation5 + $0x488] sm:$0xff] }
 0x173   : > { %1736 = vmatprep.subr.mxu1 %v2051_v0  ;;  %1511 = vmatpush3.msra.mxu0 %v645_v44  ;;  %v881_v43 = vld [vmem:[#allocation5 + $0x588] sm:$0xff]  ;;  %v864_v44 = vld [vmem:[#allocation5 + $0x500] sm:$0xff] }
 0x174   : > { %1737 = vmatpush3.msra.mxu1 %v677_v45  ;;  %1532 = vmatprep.subr.mxu0 %v879_v46  ;;  %v848_v45 = vld [vmem:[#allocation5 + $0x480] sm:$0xff] }
 0x175   : > { %1741 = vmatprep.subr.mxu1 %v2051_v0  ;;  %v880_v46 = vld [vmem:[#allocation5 + $0x580] sm:$0xff] }
 0x214   : > { %v1460_v47 = vpop.f32.mrf.mxu0  ;;  %v634_v49 = vpop.f32.mrf.mxu1 }
 0x216   : > { %v1461_v51 = vpop.f32.mrf.mxu0  ;;  %v1705_v52 = vpop.f32.mrf.mxu1 }
 0x217   : > { %v1462_v54 = vadd.f32 %v1461_v51, %v1460_v47  ;;  %v1082_v47 = vld [vmem:[#allocation5 + $0x6f8] sm:$0xff]  ;;  %v1369_v51 = vld [vmem:[#allocation7 + $0x2] ss:$0 sm:$0xff] }
 0x219   : > { %v565_v55 = vadd.f32 %v1462_v54, %v1368_v50 }
 0x21b   : > { %v635_v56 = vadd.f32 %v634_v49, %v565_v55 }
 0x21d   : > { %v638_v58 = vadd.f32 %v2268_v57, %v635_v56  ;;  %v862_v57 = vld [vmem:[#allocation5 + $0x4f0] sm:$0xff] }
 0x21f   : > { %1886 = vtanh.f32 %v638_v58 }
 0x22c   : > { %v2294_v59 = vpop.eup %1886 }
 0x22d   : > { %765 = vmatprep.mubr.f32.mxu0 %v2294_v59  ;;  %v640_v60 = vrot.slane %v2294_v59, 7  ;;  %v642_v61 = vrot.slane %v2294_v59, 1 }
 0x22f   : > { %v641_v62 = vmul.f32 %v2236_v48, %v640_v60  ;;  %v643_v63 = vmul.f32 %v2241_v53, %v642_v61 }
 0x231   : > { %766 = vmatmul.mubr.f32.vlgmr.msra.gmra.mxu0 %v641_v62  ;;  %1739 = vmatmul.mubr.f32.vlgmr.msra.gmra.mxu1 %v643_v63 }
 0x232   : > { %1533 = vmatpush3.msra.mxu0 %v863_v1  ;;  %1742 = vmatpush3.msra.mxu1 %v895_v41 }
 0x233   : > { %1534 = vmatprep.subr.mxu0 %v878_v2  ;;  %1743 = vmatprep.subr.mxu1 %v2051_v0  ;;  %v1066_v2 = vld [vmem:[#allocation5 + $0x678] sm:$0xff] }
 0x234   : > { %1773 = vmatprep.mubr.msk.f32.mxu1 %vm2052_vm0, %v2051_v0  ;;  %1535 = vmatpush3.msra.mxu0 %v862_v57  ;;  %v1098_v57 = vld [vmem:[#allocation5 + $0x778] sm:$0xff] }
 0x235   : > { %1744 = vmatpush3.msra.mxu1 %v894_v3  ;;  %1536 = vmatprep.subr.mxu0 %v877_v4  ;;  %v1081_v3 = vld [vmem:[#allocation5 + $0x6f0] sm:$0xff] }
 0x236   : > { %1745 = vmatprep.subr.mxu1 %v2051_v0  ;;  %1537 = vmatpush3.msra.mxu0 %v861_v5  ;;  %v1097_v4 = vld [vmem:[#allocation5 + $0x770] sm:$0xff]  ;;  %v1080_v5 = vld [vmem:[#allocation5 + $0x6e8] sm:$0xff] }
 0x237   : > { %1746 = vmatpush3.msra.mxu1 %v893_v6  ;;  %1538 = vmatprep.subr.mxu0 %v876_v7  ;;  %v1064_v6 = vld [vmem:[#allocation5 + $0x668] sm:$0xff] }
 0x238   : > { %1747 = vmatprep.subr.mxu1 %v2051_v0  ;;  %1539 = vmatpush3.msra.mxu0 %v860_v8  ;;  %v1096_v7 = vld [vmem:[#allocation5 + $0x768] sm:$0xff]  ;;  %v1079_v8 = vld [vmem:[#allocation5 + $0x6e0] sm:$0xff] }
 0x239   : > { %1748 = vmatpush3.msra.mxu1 %v892_v9  ;;  %1540 = vmatprep.subr.mxu0 %v875_v10  ;;  %v1063_v9 = vld [vmem:[#allocation5 + $0x660] sm:$0xff] }
 0x23a   : > { %1749 = vmatprep.subr.mxu1 %v2051_v0  ;;  %1541 = vmatpush3.msra.mxu0 %v859_v11  ;;  %v1095_v10 = vld [vmem:[#allocation5 + $0x760] sm:$0xff]  ;;  %v1078_v11 = vld [vmem:[#allocation5 + $0x6d8] sm:$0xff] }
 0x23b   : > { %1750 = vmatpush3.msra.mxu1 %v891_v12  ;;  %1542 = vmatprep.subr.mxu0 %v874_v13  ;;  %v1062_v12 = vld [vmem:[#allocation5 + $0x658] sm:$0xff] }
 0x23c   : > { %1751 = vmatprep.subr.mxu1 %v2051_v0  ;;  %1543 = vmatpush3.msra.mxu0 %v858_v14  ;;  %v1094_v13 = vld [vmem:[#allocation5 + $0x758] sm:$0xff]  ;;  %v1077_v14 = vld [vmem:[#allocation5 + $0x6d0] sm:$0xff] }
 0x23d   : > { %1752 = vmatpush3.msra.mxu1 %v890_v15  ;;  %1544 = vmatprep.subr.mxu0 %v873_v16  ;;  %v1061_v15 = vld [vmem:[#allocation5 + $0x650] sm:$0xff] }
 0x23e   : > { %1753 = vmatprep.subr.mxu1 %v2051_v0  ;;  %1545 = vmatpush3.msra.mxu0 %v857_v17  ;;  %v1093_v16 = vld [vmem:[#allocation5 + $0x750] sm:$0xff]  ;;  %v1076_v17 = vld [vmem:[#allocation5 + $0x6c8] sm:$0xff] }
 0x23f   : > { %1754 = vmatpush3.msra.mxu1 %v889_v18  ;;  %1546 = vmatprep.subr.mxu0 %v872_v19  ;;  %v1060_v18 = vld [vmem:[#allocation5 + $0x648] sm:$0xff] }
 0x240   : > { %1755 = vmatprep.subr.mxu1 %v2051_v0  ;;  %1547 = vmatpush3.msra.mxu0 %v856_v20  ;;  %v1092_v19 = vld [vmem:[#allocation5 + $0x748] sm:$0xff]  ;;  %v1075_v20 = vld [vmem:[#allocation5 + $0x6c0] sm:$0xff] }
 0x241   : > { %1756 = vmatpush3.msra.mxu1 %v888_v21  ;;  %1548 = vmatprep.subr.mxu0 %v871_v22  ;;  %v1059_v21 = vld [vmem:[#allocation5 + $0x640] sm:$0xff] }
 0x242   : > { %1757 = vmatprep.subr.mxu1 %v2051_v0  ;;  %1549 = vmatpush3.msra.mxu0 %v855_v23  ;;  %v1091_v22 = vld [vmem:[#allocation5 + $0x740] sm:$0xff]  ;;  %v1074_v23 = vld [vmem:[#allocation5 + $0x6b8] sm:$0xff] }
 0x243   : > { %1758 = vmatpush3.msra.mxu1 %v887_v24  ;;  %1550 = vmatprep.subr.mxu0 %v870_v25  ;;  %v1058_v24 = vld [vmem:[#allocation5 + $0x638] sm:$0xff] }
 0x244   : > { %1759 = vmatprep.subr.mxu1 %v2051_v0  ;;  %1551 = vmatpush3.msra.mxu0 %v854_v26  ;;  %v1090_v25 = vld [vmem:[#allocation5 + $0x738] sm:$0xff]  ;;  %v1073_v26 = vld [vmem:[#allocation5 + $0x6b0] sm:$0xff] }
 0x245   : > { %1760 = vmatpush3.msra.mxu1 %v886_v27  ;;  %1552 = vmatprep.subr.mxu0 %v869_v28  ;;  %v1057_v27 = vld [vmem:[#allocation5 + $0x630] sm:$0xff] }
 0x246   : > { %1761 = vmatprep.subr.mxu1 %v2051_v0  ;;  %1553 = vmatpush3.msra.mxu0 %v853_v29  ;;  %v1089_v28 = vld [vmem:[#allocation5 + $0x730] sm:$0xff]  ;;  %v1072_v29 = vld [vmem:[#allocation5 + $0x6a8] sm:$0xff] }
 0x247   : > { %1762 = vmatpush3.msra.mxu1 %v885_v30  ;;  %1554 = vmatprep.subr.mxu0 %v868_v31  ;;  %v1056_v30 = vld [vmem:[#allocation5 + $0x628] sm:$0xff] }
 0x248   : > { %1763 = vmatprep.subr.mxu1 %v2051_v0  ;;  %1555 = vmatpush3.msra.mxu0 %v852_v32  ;;  %v1088_v31 = vld [vmem:[#allocation5 + $0x728] sm:$0xff]  ;;  %v1071_v32 = vld [vmem:[#allocation5 + $0x6a0] sm:$0xff] }
 0x249   : > { %1764 = vmatpush3.msra.mxu1 %v884_v33  ;;  %1556 = vmatprep.subr.mxu0 %v867_v34  ;;  %v1055_v33 = vld [vmem:[#allocation5 + $0x620] sm:$0xff] }
 0x24a   : > { %1765 = vmatprep.subr.mxu1 %v2051_v0  ;;  %1557 = vmatpush3.msra.mxu0 %v851_v35  ;;  %v1087_v34 = vld [vmem:[#allocation5 + $0x720] sm:$0xff]  ;;  %v1070_v35 = vld [vmem:[#allocation5 + $0x698] sm:$0xff] }
 0x24b   : > { %1766 = vmatpush3.msra.mxu1 %v883_v36  ;;  %1558 = vmatprep.subr.mxu0 %v866_v37  ;;  %v1054_v36 = vld [vmem:[#allocation5 + $0x618] sm:$0xff] }
 0x24c   : > { %1767 = vmatprep.subr.mxu1 %v2051_v0  ;;  %1559 = vmatpush3.msra.mxu0 %v850_v38  ;;  %v1086_v37 = vld [vmem:[#allocation5 + $0x718] sm:$0xff]  ;;  %v1069_v38 = vld [vmem:[#allocation5 + $0x690] sm:$0xff] }
 0x24d   : > { %1768 = vmatpush3.msra.mxu1 %v882_v39  ;;  %1560 = vmatprep.subr.mxu0 %v865_v40  ;;  %v1053_v39 = vld [vmem:[#allocation5 + $0x610] sm:$0xff] }
 0x24e   : > { %1769 = vmatprep.subr.mxu1 %v2051_v0  ;;  %1561 = vmatpush3.msra.mxu0 %v849_v42  ;;  %v1085_v40 = vld [vmem:[#allocation5 + $0x710] sm:$0xff]  ;;  %v1068_v42 = vld [vmem:[#allocation5 + $0x688] sm:$0xff] }
 0x24f   : > { %1770 = vmatpush3.msra.mxu1 %v881_v43  ;;  %1562 = vmatprep.subr.mxu0 %v864_v44  ;;  %v1052_v43 = vld [vmem:[#allocation5 + $0x608] sm:$0xff] }
 0x250   : > { %1771 = vmatprep.subr.mxu1 %v2051_v0  ;;  %1563 = vmatpush3.msra.mxu0 %v848_v45  ;;  %v1084_v44 = vld [vmem:[#allocation5 + $0x708] sm:$0xff]  ;;  %v1067_v45 = vld [vmem:[#allocation5 + $0x680] sm:$0xff] }
 0x251   : > { %1772 = vmatpush3.msra.mxu1 %v880_v46  ;;  %1584 = vmatprep.subr.mxu0 %v1082_v47  ;;  %v1051_v46 = vld [vmem:[#allocation5 + $0x600] sm:$0xff] }
 0x252   : > { %1776 = vmatprep.subr.mxu1 %v2051_v0  ;;  %v1083_v47 = vld [vmem:[#allocation5 + $0x700] sm:$0xff] }
 0x2f1   : > { %v1512_v49 = vpop.f32.mrf.mxu0  ;;  %v837_v50 = vpop.f32.mrf.mxu1 }
 0x2f3   : > { %v1513_v52 = vpop.f32.mrf.mxu0  ;;  %v1740_v54 = vpop.f32.mrf.mxu1 }
 0x2f4   : > { %v1514_v55 = vadd.f32 %v1513_v52, %v1512_v49 }
 0x2f6   : > { %v768_v56 = vadd.f32 %v1514_v55, %v1369_v51  ;;  %v1370_v51 = vld [vmem:[#allocation7 + $0x3] ss:$0 sm:$0xff] }
 0x2f8   : > { %v838_v58 = vadd.f32 %v837_v50, %v768_v56 }
 0x2fa   : > { %v841_v60 = vadd.f32 %v2294_v59, %v838_v58  ;;  %v1065_v59 = vld [vmem:[#allocation5 + $0x670] sm:$0xff] }
 0x2fc   : > { %1888 = vtanh.f32 %v841_v60 }
 0x309   : > { %v2320_v61 = vpop.eup %1888 }
 0x30a   : > { %968 = vmatprep.mubr.f32.mxu0 %v2320_v61  ;;  %v843_v62 = vrot.slane %v2320_v61, 7  ;;  %v845_v63 = vrot.slane %v2320_v61, 1 }
 0x30c   : > { %v844_v1 = vmul.f32 %v2236_v48, %v843_v62  ;;  %v846_v41 = vmul.f32 %v2241_v53, %v845_v63 }
 0x30e   : > { %969 = vmatmul.mubr.f32.vlgmr.msra.gmra.mxu0 %v844_v1  ;;  %1774 = vmatmul.mubr.f32.vlgmr.msra.gmra.mxu1 %v846_v41 }
 0x30f   : > { %1585 = vmatpush3.msra.mxu0 %v1066_v2  ;;  %1777 = vmatpush3.msra.mxu1 %v1098_v57 }
 0x310   : > { %1586 = vmatprep.subr.mxu0 %v1081_v3  ;;  %1778 = vmatprep.subr.mxu1 %v2051_v0  ;;  %v1371_v3 = vld [vmem:[#allocation7 + $0x4] ss:$0 sm:$0xff] }
 0x311   : > { %1808 = vmatprep.mubr.msk.f32.mxu1 %vm2052_vm0, %v2051_v0  ;;  %1587 = vmatpush3.msra.mxu0 %v1065_v59 }
 0x312   : > { %1779 = vmatpush3.msra.mxu1 %v1097_v4  ;;  %1588 = vmatprep.subr.mxu0 %v1080_v5 }
 0x313   : > { %1780 = vmatprep.subr.mxu1 %v2051_v0  ;;  %1589 = vmatpush3.msra.mxu0 %v1064_v6 }
 0x314   : > { %1781 = vmatpush3.msra.mxu1 %v1096_v7  ;;  %1590 = vmatprep.subr.mxu0 %v1079_v8 }
 0x315   : > { %1782 = vmatprep.subr.mxu1 %v2051_v0  ;;  %1591 = vmatpush3.msra.mxu0 %v1063_v9 }
 0x316   : > { %1783 = vmatpush3.msra.mxu1 %v1095_v10  ;;  %1592 = vmatprep.subr.mxu0 %v1078_v11 }
 0x317   : > { %1784 = vmatprep.subr.mxu1 %v2051_v0  ;;  %1593 = vmatpush3.msra.mxu0 %v1062_v12 }
 0x318   : > { %1785 = vmatpush3.msra.mxu1 %v1094_v13  ;;  %1594 = vmatprep.subr.mxu0 %v1077_v14 }
 0x319   : > { %1786 = vmatprep.subr.mxu1 %v2051_v0  ;;  %1595 = vmatpush3.msra.mxu0 %v1061_v15 }
 0x31a   : > { %1787 = vmatpush3.msra.mxu1 %v1093_v16  ;;  %1596 = vmatprep.subr.mxu0 %v1076_v17 }
 0x31b   : > { %1788 = vmatprep.subr.mxu1 %v2051_v0  ;;  %1597 = vmatpush3.msra.mxu0 %v1060_v18 }
 0x31c   : > { %1789 = vmatpush3.msra.mxu1 %v1092_v19  ;;  %1598 = vmatprep.subr.mxu0 %v1075_v20 }
 0x31d   : > { %1790 = vmatprep.subr.mxu1 %v2051_v0  ;;  %1599 = vmatpush3.msra.mxu0 %v1059_v21 }
 0x31e   : > { %1791 = vmatpush3.msra.mxu1 %v1091_v22  ;;  %1600 = vmatprep.subr.mxu0 %v1074_v23 }
 0x31f   : > { %1792 = vmatprep.subr.mxu1 %v2051_v0  ;;  %1601 = vmatpush3.msra.mxu0 %v1058_v24 }
 0x320   : > { %1793 = vmatpush3.msra.mxu1 %v1090_v25  ;;  %1602 = vmatprep.subr.mxu0 %v1073_v26 }
 0x321   : > { %1794 = vmatprep.subr.mxu1 %v2051_v0  ;;  %1603 = vmatpush3.msra.mxu0 %v1057_v27 }
 0x322   : > { %1795 = vmatpush3.msra.mxu1 %v1089_v28  ;;  %1604 = vmatprep.subr.mxu0 %v1072_v29 }
 0x323   : > { %1796 = vmatprep.subr.mxu1 %v2051_v0  ;;  %1605 = vmatpush3.msra.mxu0 %v1056_v30 }
 0x324   : > { %1797 = vmatpush3.msra.mxu1 %v1088_v31  ;;  %1606 = vmatprep.subr.mxu0 %v1071_v32 }
 0x325   : > { %1798 = vmatprep.subr.mxu1 %v2051_v0  ;;  %1607 = vmatpush3.msra.mxu0 %v1055_v33 }
 0x326   : > { %1799 = vmatpush3.msra.mxu1 %v1087_v34  ;;  %1608 = vmatprep.subr.mxu0 %v1070_v35 }
 0x327   : > { %1800 = vmatprep.subr.mxu1 %v2051_v0  ;;  %1609 = vmatpush3.msra.mxu0 %v1054_v36 }
 0x328   : > { %1801 = vmatpush3.msra.mxu1 %v1086_v37  ;;  %1610 = vmatprep.subr.mxu0 %v1069_v38 }
 0x329   : > { %1802 = vmatprep.subr.mxu1 %v2051_v0  ;;  %1611 = vmatpush3.msra.mxu0 %v1053_v39 }
 0x32a   : > { %1803 = vmatpush3.msra.mxu1 %v1085_v40  ;;  %1612 = vmatprep.subr.mxu0 %v1068_v42 }
 0x32b   : > { %1804 = vmatprep.subr.mxu1 %v2051_v0  ;;  %1613 = vmatpush3.msra.mxu0 %v1052_v43 }
 0x32c   : > { %1805 = vmatpush3.msra.mxu1 %v1084_v44  ;;  %1614 = vmatprep.subr.mxu0 %v1067_v45 }
 0x32d   : > { %1806 = vmatprep.subr.mxu1 %v2051_v0  ;;  %1615 = vmatpush3.msra.mxu0 %v1051_v46 }
 0x32e   : > { %1807 = vmatpush3.msra.mxu1 %v1083_v47 }
 0x3ce   : > { %v1564_v49 = vpop.f32.mrf.mxu0  ;;  %v1040_v50 = vpop.f32.mrf.mxu1 }
 0x3d0   : > { %v1565_v52 = vpop.f32.mrf.mxu0  ;;  %v1775_v54 = vpop.f32.mrf.mxu1 }
 0x3d1   : > { %v1566_v55 = vadd.f32 %v1565_v52, %v1564_v49 }
 0x3d3   : > { %v971_v56 = vadd.f32 %v1566_v55, %v1370_v51 }
 0x3d5   : > { %v1041_v58 = vadd.f32 %v1040_v50, %v971_v56 }
 0x3d7   : > { %v1044_v60 = vadd.f32 %v2320_v61, %v1041_v58 }
 0x3d9   : > { %1890 = vtanh.f32 %v1044_v60 }
 0x3e6   : > { %v1891_v62 = vpop.eup %1890 }
 0x3e7   : > { %1171 = vmatprep.mubr.f32.mxu0 %v1891_v62  ;;  %v1046_v63 = vrot.slane %v1891_v62, 7  ;;  %v1048_v1 = vrot.slane %v1891_v62, 1 }
 0x3e9   : > { %v1047_v0 = vmul.f32 %v2236_v48, %v1046_v63  ;;  %v1049_v41 = vmul.f32 %v2241_v53, %v1048_v1 }
 0x3eb   : > { %1172 = vmatmul.mubr.f32.vlgmr.msra.gmra.mxu0 %v1047_v0  ;;  %1809 = vmatmul.mubr.f32.vlgmr.msra.gmra.mxu1 %v1049_v41 }
 0x4ab   : > { %v1616_v2 = vpop.f32.mrf.mxu0  ;;  %v1243_v57 = vpop.f32.mrf.mxu1 }
 0x4ad   : > { %v1617_v59 = vpop.f32.mrf.mxu0  ;;  %v1810_v4 = vpop.f32.mrf.mxu1 }
 0x4ae   : > { %v1618_v61 = vadd.f32 %v1617_v59, %v1616_v2 }
 0x4b0   : > { %v1174_v5 = vadd.f32 %v1618_v61, %v1371_v3 }
 0x4b2   : > { %v1244_v6 = vadd.f32 %v1243_v57, %v1174_v5 }
 0x4b4   : > { %v1247_v7 = vadd.f32 %v1891_v62, %v1244_v6 }
 0x4b6   : > { %1892 = vtanh.f32 %v1247_v7 }
 0x4c3   : > { %v1893_v48 = vpop.eup %1892 }
 0x4c4   : > { %1249 = vst [vmem:[%s214_s20] sm:$0xff] %v1893_v48 }
 0x4c5   : > { %1987 = shalt.err (!%p1984_p5)
}
 0x4c6   : > { %s1988_s24 = scalar_lea.hbm %s2353_s5, 128  ;;  %s1992_s26 = scalar_lea.hbm %s2393_s3, 256 }
 0x4c7   : > { %p1989_p2 = scmp.ne.s32.totalorder %s2353_s5, %s1988_s24  ;;  %p1993_p1 = scmp.lt.s32.totalorder %s2353_s5, %s2393_s3 }
 0x4c8   : > { %p1994_p4 = scmp.lt.s32.totalorder %s1992_s26, %s1988_s24 }
 0x4c9   : > { %p1990_p9 = pnand %p1989_p2, %p2408_p10 }
 0x4ca   : > { %p1995_p6 = por %p1994_p4, %p1993_p1 }
 0x4cb   : > { %p1991_p12 = pneg %p1990_p9 }
 0x4cd   : > { %p1996_p8 = pnand %p1995_p6, %p1991_p12 }
 0x4cf   : > { %1999 = shalt.err (!%p1996_p8)
}
 0x4d0   : > { %1821 = dma.vmem_to_hbm [thread:$0]  (%p2408_p10), %s1265_s28, 128, %s2353_s5, %s1251_s8  }
 0x4d1 PF: > { %s1276_s6 = sand.u32 1, %s2030_s12   ;;  %p2409_p11 = scmp.ne.s32.totalorder %s2399_s19, 0 }
 0x4d2   : > { %p2410_p7 = scmp.ge.s32.totalorder %s2042_s15, 2  ;;  %s1277_s7 = scalar_lea.sflag [#allocation4], %s1276_s6 }
 0x4d4   : > { %p1835_p13 = pnand %p2410_p7, %p2409_p11 }
 0x4d6   : > { %p1836_p0 = pneg %p1835_p13 }
 0x4d8   : > { %2025 = dma.done.wait (%p1836_p0), %s1277_s7, 128  }
 0x4d9   : > { %2027 = vsyncadd (%p1836_p0), %s1277_s7, 4294967168  ;;  %p17_p3 = scmp.ge.s32.totalorder %s2154_s10, 4   ;;  %s2411_s12 = smov %s2034_s13 }
 0x4da   : > { %s2412_s13 = smov %s2038_s14  ;;  %s2413_s14 = smov %s2163_s21 }
 0x4db   : > { %s2414_s15 = smov %s2154_s10  ;;  %19 = sbr.rel (!%p17_p3) target bundleno = 6 (0x6), region = 93 }
 0x4e0   :  { %1282 = vsyncpa [#allocation3], 1 }
 0x4e1   :  { %1284 = vsyncpa [#allocation3 + $0x1], 1 }
 0x4e2   :  { %1285 = vsyncpa [#allocation6], 1 }
 0x4e3   :  { %1286 = vsyncpa [#allocation4], 1 }
 0x4e4   :  { %1288 = vsyncpa [#allocation4 + $0x1], 1 }

</bundles_post_ra>
